<compile_context>
chip_gen: v7x
topology: tpu7x:2x2x1
jax: 0.10.0
libtpu: 0.0.40
codegen_flags: <defaults>
</compile_context>

<pallas_src>
import functools

import jax
import jax.numpy as jnp
from jax import lax
from jax.experimental import pallas as pl
from jax.experimental.pallas import tpu as pltpu

_LN_EPS = 1e-5
_BF16 = jnp.bfloat16
_F32 = jnp.float32


# ---------------------------------------------------------------------------
# Fused encoder kernel (one grid step == one batch row)
# ---------------------------------------------------------------------------
def _encoder_kernel(x_ref,
                    wq3_ref, bq3_ref, wk3_ref, bk3_ref, wv3_ref, bv3_ref,
                    wo3_ref, bo_ref, ln1g_ref, ln1b_ref,
                    w1_ref, b1_ref, w2_ref, b2_ref, ln2g_ref, ln2b_ref,
                    out_ref,
                    tmp_scr, qg_scr, kg_scr, vg_scr, ctxg_scr,
                    *, num_head, scale):
    S, E = x_ref.shape
    H = num_head
    Dh = E // H
    r = S // H                            # original rows per attention group

    x = x_ref[...]                        # [S, E] f32
    x_bf = x.astype(_BF16)

    # ---- 1) fused Q/K/V projections, staged straight into the grouped view --
    # wq3[j] is the [E, Dh] column-chunk j of Wq^T, so jnp.dot gives the
    # j-th Dh-wide slice of Q.  Group h <- original rows [h*r, (h+1)*r); its
    # rows are stored chunk-major (permuted), which is harmless (see above).
    for w3_ref, b3_ref, g_scr in ((wq3_ref, bq3_ref, qg_scr),
                                  (wk3_ref, bk3_ref, kg_scr),
                                  (wv3_ref, bv3_ref, vg_scr)):
        for j in range(H):
            tmp_scr[...] = (jnp.dot(x_bf, w3_ref[j],
                                    preferred_element_type=_F32) + b3_ref[j])
            for h in range(H):
                g_scr[h, j * r:(j + 1) * r, :] = tmp_scr[h * r:(h + 1) * r, :]

    # ---- 2) grouped scaled-dot-product attention (all groups in one batch) --
    qg = qg_scr[...].astype(_BF16)
    kg = kg_scr[...].astype(_BF16)
    vg = vg_scr[...].astype(_BF16)
    s = jnp.einsum('hsd,htd->hst', qg, kg,
                   preferred_element_type=_F32) * scale
    s = s - jnp.max(s, axis=-1, keepdims=True)        # stable softmax, f32
    p = jnp.exp(s)
    p = p * pl.reciprocal(jnp.sum(p, axis=-1, keepdims=True), approx=True)
    ctxg_scr[...] = jnp.einsum('hst,htd->hsd', p.astype(_BF16), vg,
                               preferred_element_type=_F32)

    # ---- 3) output projection: ctx @ Wo^T, chunked over Dh column blocks ----
    # Cj gathers column-chunk j of the context back into original row order
    # (undoing the staging permutation); proj = sum_j Cj @ Wo^T[j*Dh:(j+1)*Dh].
    acc = x + bo_ref[...]                 # residual + fc bias, f32
    for j in range(H):
        for h in range(H):
            tmp_scr[h * r:(h + 1) * r, :] = ctxg_scr[h, j * r:(j + 1) * r, :]
        acc = acc + jnp.dot(tmp_scr[...].astype(_BF16), wo3_ref[j],
                            preferred_element_type=_F32)

    def layer_norm(v, g_ref, b_ref):      # all f32 (VPU/EUP friendly on v5e)
        mu = jnp.mean(v, axis=-1, keepdims=True)
        var = jnp.mean(jnp.square(v - mu), axis=-1, keepdims=True)
        return (v - mu) * lax.rsqrt(var + _LN_EPS) * g_ref[...] + b_ref[...]

    # Multi_Head_Attention tail: fc(ctx) [+ dropout == identity, eval] + x -> LN
    # TODO(synk): nn.Dropout is treated as identity (eval / inference mode).
    attn = layer_norm(acc, ln1g_ref, ln1b_ref)

    # Positional_Wise_Feed_Forward: fc1 -> relu -> fc2 [+dropout] + res -> LN
    h1 = jnp.maximum(jnp.dot(attn.astype(_BF16), w1_ref[...],
                             preferred_element_type=_F32) + b1_ref[...], 0.0)
    ff = jnp.dot(h1.astype(_BF16), w2_ref[...],
                 preferred_element_type=_F32) + b2_ref[...]
    out_ref[...] = layer_norm(ff + attn, ln2g_ref, ln2b_ref).astype(out_ref.dtype)


# ---------------------------------------------------------------------------
# One-time parameter prep (hoisted out of the per-call path)
# ---------------------------------------------------------------------------
def prep_encoder_params(p, num_head):
    """Transpose nn.Linear weights to [in, out], cast matmul weights to bf16,
    pre-split Q/K/V output columns and the out-proj input rows into per-Dh
    chunks, and give 1-D vectors a TPU-friendly (1, N) / (H, 1, Dh) shape."""
    E = p['wq'].shape[0]
    Dh = E // num_head
    row = lambda a: a.reshape(1, -1).astype(_F32)

    def split_out_cols(w):                       # [out, in] -> [H, in, Dh] bf16
        wt = w.T.astype(_BF16)                   # [in, out]
        return wt.reshape(E, num_head, Dh).transpose(1, 0, 2)

    return dict(
        wq3=split_out_cols(p['wq']),
        bq3=p['bq'].reshape(num_head, 1, Dh).astype(_F32),
        wk3=split_out_cols(p['wk']),
        bk3=p['bk'].reshape(num_head, 1, Dh).astype(_F32),
        wv3=split_out_cols(p['wv']),
        bv3=p['bv'].reshape(num_head, 1, Dh).astype(_F32),
        wo3=p['wo'].T.astype(_BF16).reshape(num_head, Dh, E),  # [H, Dh, out]
        bo=row(p['bo']),
        ln1_g=row(p['ln1_g']), ln1_b=row(p['ln1_b']),
        w1=p['w1'].T.astype(_BF16), b1=row(p['b1']),
        w2=p['w2'].T.astype(_BF16), b2=row(p['b2']),
        ln2_g=row(p['ln2_g']), ln2_b=row(p['ln2_b']),
    )


# ---------------------------------------------------------------------------
# Wrapper: single fused pallas_call, grid over batch rows
# ---------------------------------------------------------------------------
@functools.partial(jax.jit, static_argnames=("num_head",))
def encoder_forward(x, p, *, num_head):
    B, S, E = x.shape
    assert E % num_head == 0
    # TODO(synk): S % num_head != 0 (the module's .view then splits original
    # rows across groups) is not supported by this fused kernel.
    assert S % num_head == 0
    Dh = E // num_head
    hidden = p['w1'].shape[1]
    scale = float(Dh) ** -0.5

    def const_spec(a):
        nd = a.ndim
        return pl.BlockSpec(a.shape, lambda b, _n=nd: (0,) * _n)

    row_spec = pl.BlockSpec((pl.Squeezed(), S, E), lambda b: (b, 0, 0))

    param_order = ('wq3', 'bq3', 'wk3', 'bk3', 'wv3', 'bv3',
                   'wo3', 'bo', 'ln1_g', 'ln1_b',
                   'w1', 'b1', 'w2', 'b2', 'ln2_g', 'ln2_b')
    param_args = tuple(p[k] for k in param_order)

    flops = B * (3 * 2 * S * E * E                 # Q/K/V projections
                 + num_head * 4 * S * S * Dh       # QK^T and PV
                 + 2 * S * E * E                   # output projection
                 + 4 * S * E * hidden)             # FFN fc1 + fc2
    bytes_accessed = (2 * B * S * E * 4
                      + sum(a.size * a.dtype.itemsize for a in param_args))
    cost = pl.CostEstimate(flops=int(flops),
                           transcendentals=int(B * num_head * S * S),
                           bytes_accessed=int(bytes_accessed))

    return pl.pallas_call(
        functools.partial(_encoder_kernel, num_head=num_head, scale=scale),
        out_shape=jax.ShapeDtypeStruct((B, S, E), x.dtype),
        grid_spec=pltpu.PrefetchScalarGridSpec(
            num_scalar_prefetch=0,
            grid=(B,),                     # batch rows; each step = full layer
            in_specs=[row_spec] + [const_spec(a) for a in param_args],
            out_specs=row_spec,
            scratch_shapes=[
                pltpu.VMEM((S, Dh), _F32),             # per-chunk staging
                pltpu.VMEM((num_head, S, Dh), _F32),   # grouped Q
                pltpu.VMEM((num_head, S, Dh), _F32),   # grouped K
                pltpu.VMEM((num_head, S, Dh), _F32),   # grouped V
                pltpu.VMEM((num_head, S, Dh), _F32),   # grouped context
            ]),
        compiler_params=pltpu.CompilerParams(
            dimension_semantics=("parallel",)),
        cost_estimate=cost,
    )(x, *param_args)


# ---------------------------------------------------------------------------
# Parameters + pure-JAX reference (mirrors the PyTorch module line-by-line;
# matmul operands rounded to bf16 with f32 accumulation, like the kernel)
# ---------------------------------------------------------------------------
def init_params(key, dim_model, hidden):
    ks = jax.random.split(key, 6)

    def linear_init(k, out_f, in_f):                 # PyTorch nn.Linear init
        kw, kb = jax.random.split(k)
        bound = 1.0 / (in_f ** 0.5)
        w = jax.random.uniform(kw, (out_f, in_f), _F32, -bound, bound)
        b = jax.random.uniform(kb, (out_f,), _F32, -bound, bound)
        return w, b

    wq, bq = linear_init(ks[0], dim_model, dim_model)
    wk, bk = linear_init(ks[1], dim_model, dim_model)
    wv, bv = linear_init(ks[2], dim_model, dim_model)
    wo, bo = linear_init(ks[3], dim_model, dim_model)
    w1, b1 = linear_init(ks[4], hidden, dim_model)
    w2, b2 = linear_init(ks[5], dim_model, hidden)
    return dict(
        wq=wq, bq=bq, wk=wk, bk=bk, wv=wv, bv=bv, wo=wo, bo=bo,
        ln1_g=jnp.ones((dim_model,), _F32), ln1_b=jnp.zeros((dim_model,), _F32),
        w1=w1, b1=b1, w2=w2, b2=b2,
        ln2_g=jnp.ones((dim_model,), _F32), ln2_b=jnp.zeros((dim_model,), _F32),
    )


def encoder_ref(x, p, num_head):
    B, S, E = x.shape
    Dh = E // num_head

    def lin(v, w, b):                                 # bf16 operands, f32 acc
        return jnp.dot(v.astype(_BF16), w.T.astype(_BF16),
                       preferred_element_type=_F32) + b

    def layer_norm(v, g, b):
        mu = v.mean(-1, keepdims=True)
        var = ((v - mu) ** 2).mean(-1, keepdims=True)
        return (v - mu) / jnp.sqrt(var + _LN_EPS) * g + b

    Q = lin(x, p['wq'], p['bq']).reshape(B * num_head, -1, Dh)
    K = lin(x, p['wk'], p['bk']).reshape(B * num_head, -1, Dh)
    V = lin(x, p['wv'], p['bv']).reshape(B * num_head, -1, Dh)
    scale = Dh ** (-0.5)
    att = jnp.einsum('gsd,gtd->gst', Q.astype(_BF16), K.astype(_BF16),
                     preferred_element_type=_F32) * scale
    att = jax.nn.softmax(att, axis=-1)
    ctx = jnp.einsum('gst,gtd->gsd', att.astype(_BF16), V.astype(_BF16),
                     preferred_element_type=_F32).reshape(B, -1, num_head * Dh)
    out = layer_norm(lin(ctx, p['wo'], p['bo']) + x, p['ln1_g'], p['ln1_b'])
    h = jax.nn.relu(lin(out, p['w1'], p['b1']))
    return layer_norm(lin(h, p['w2'], p['b2']) + out, p['ln2_g'], p['ln2_b'])


if __name__ == "__main__":
    # Small shapes implied by the module: batch=2, seq=8, dim_model=32,
    # num_head=4 (dim_head=8), hidden=64.
    B, S = 2, 8
    dim_model, num_head, hidden = 32, 4, 64

    key = jax.random.PRNGKey(0)
    kx, kp = jax.random.split(key)
    x = jax.random.normal(kx, (B, S, dim_model), dtype=_F32)
    raw_params = init_params(kp, dim_model, hidden)
    prepped = prep_encoder_params(raw_params, num_head)

    out = jax.block_until_ready(encoder_forward(x, prepped, num_head=num_head))
    assert out.shape == (B, S, dim_model)

    ref = encoder_ref(x, raw_params, num_head)
    err = float(jnp.max(jnp.abs(out - ref)))
    # Tolerance covers MXU accumulation-order differences and the approximate
    # EUP reciprocal in the in-kernel softmax (reference uses exact division).
    assert jnp.allclose(out, ref, atol=1e-2, rtol=1e-2), \
        f"mismatch vs reference, max abs err = {err}"
    print("KERNEL_OK")
</pallas_src>

<mosaic_0001>
module attributes {stable_mosaic.version = 11 : i64} {
  func.func @_encoder_kernel(%arg0: i32, %arg1: memref<1x8x32xf32, #tpu.memory_space<vmem>>, %arg2: memref<4x32x8xbf16, #tpu.memory_space<vmem>>, %arg3: memref<4x1x8xf32, #tpu.memory_space<vmem>>, %arg4: memref<4x32x8xbf16, #tpu.memory_space<vmem>>, %arg5: memref<4x1x8xf32, #tpu.memory_space<vmem>>, %arg6: memref<4x32x8xbf16, #tpu.memory_space<vmem>>, %arg7: memref<4x1x8xf32, #tpu.memory_space<vmem>>, %arg8: memref<4x8x32xbf16, #tpu.memory_space<vmem>>, %arg9: memref<1x32xf32, #tpu.memory_space<vmem>>, %arg10: memref<1x32xf32, #tpu.memory_space<vmem>>, %arg11: memref<1x32xf32, #tpu.memory_space<vmem>>, %arg12: memref<32x64xbf16, #tpu.memory_space<vmem>>, %arg13: memref<1x64xf32, #tpu.memory_space<vmem>>, %arg14: memref<64x32xbf16, #tpu.memory_space<vmem>>, %arg15: memref<1x32xf32, #tpu.memory_space<vmem>>, %arg16: memref<1x32xf32, #tpu.memory_space<vmem>>, %arg17: memref<1x32xf32, #tpu.memory_space<vmem>>, %arg18: memref<1x8x32xf32, #tpu.memory_space<vmem>>, %arg19: memref<8x8xf32, #tpu.memory_space<vmem>>, %arg20: memref<4x8x8xf32, #tpu.memory_space<vmem>>, %arg21: memref<4x8x8xf32, #tpu.memory_space<vmem>>, %arg22: memref<4x8x8xf32, #tpu.memory_space<vmem>>, %arg23: memref<4x8x8xf32, #tpu.memory_space<vmem>>) attributes {dimension_semantics = [#tpu.dimension_semantics<parallel>], iteration_bounds = array<i64: 2>, scalar_prefetch = 0 : i64, scratch_operands = 5 : i64, tpu.core_type = #tpu.core_type<tc>, window_params = [{transform_indices = @transform_0, window_bounds = array<i64: 1, 8, 32>}, {pipeline_mode = #tpu.pipeline_mode<synchronous>, transform_indices = @transform_1, window_bounds = array<i64: 4, 32, 8>}, {pipeline_mode = #tpu.pipeline_mode<synchronous>, transform_indices = @transform_2, window_bounds = array<i64: 4, 1, 8>}, {pipeline_mode = #tpu.pipeline_mode<synchronous>, transform_indices = @transform_3, window_bounds = array<i64: 4, 32, 8>}, {pipeline_mode = #tpu.pipeline_mode<synchronous>, transform_indices = @transform_4, window_bounds = array<i64: 4, 1, 8>}, {pipeline_mode = #tpu.pipeline_mode<synchronous>, transform_indices = @transform_5, window_bounds = array<i64: 4, 32, 8>}, {pipeline_mode = #tpu.pipeline_mode<synchronous>, transform_indices = @transform_6, window_bounds = array<i64: 4, 1, 8>}, {pipeline_mode = #tpu.pipeline_mode<synchronous>, transform_indices = @transform_7, window_bounds = array<i64: 4, 8, 32>}, {pipeline_mode = #tpu.pipeline_mode<synchronous>, transform_indices = @transform_8, window_bounds = array<i64: 1, 32>}, {pipeline_mode = #tpu.pipeline_mode<synchronous>, transform_indices = @transform_9, window_bounds = array<i64: 1, 32>}, {pipeline_mode = #tpu.pipeline_mode<synchronous>, transform_indices = @transform_10, window_bounds = array<i64: 1, 32>}, {pipeline_mode = #tpu.pipeline_mode<synchronous>, transform_indices = @transform_11, window_bounds = array<i64: 32, 64>}, {pipeline_mode = #tpu.pipeline_mode<synchronous>, transform_indices = @transform_12, window_bounds = array<i64: 1, 64>}, {pipeline_mode = #tpu.pipeline_mode<synchronous>, transform_indices = @transform_13, window_bounds = array<i64: 64, 32>}, {pipeline_mode = #tpu.pipeline_mode<synchronous>, transform_indices = @transform_14, window_bounds = array<i64: 1, 32>}, {pipeline_mode = #tpu.pipeline_mode<synchronous>, transform_indices = @transform_15, window_bounds = array<i64: 1, 32>}, {pipeline_mode = #tpu.pipeline_mode<synchronous>, transform_indices = @transform_16, window_bounds = array<i64: 1, 32>}, {transform_indices = @transform_17, window_bounds = array<i64: 1, 8, 32>}]} {
    %c0 = arith.constant 0 : index
    %c0_0 = arith.constant 0 : index
    %c0_1 = arith.constant 0 : index
    %0 = vector.load %arg1[%c0, %c0_0, %c0_1] : memref<1x8x32xf32, #tpu.memory_space<vmem>>, vector<1x8x32xf32>
    %1 = vector.shape_cast %0 : vector<1x8x32xf32> to vector<8x32xf32>
    %2 = arith.truncf %1 : vector<8x32xf32> to vector<8x32xbf16>
    %c0_2 = arith.constant 0 : index
    %c0_3 = arith.constant 0 : index
    %c0_4 = arith.constant 0 : index
    %3 = vector.load %arg2[%c0_2, %c0_3, %c0_4] : memref<4x32x8xbf16, #tpu.memory_space<vmem>>, vector<1x32x8xbf16>
    %4 = vector.shape_cast %3 : vector<1x32x8xbf16> to vector<32x8xbf16>
    %cst = arith.constant dense<0.000000e+00> : vector<8x8xf32>
    %5 = tpu.matmul %2, %4, %cst {dimension_numbers = #tpu.dot_dimension_numbers<[1], [0], [0], [1], [0, 0, 1, 1], [], []>} : vector<8x32xbf16>, vector<32x8xbf16>, vector<8x8xf32> -> vector<8x8xf32>
    %c0_5 = arith.constant 0 : index
    %c0_6 = arith.constant 0 : index
    %c0_7 = arith.constant 0 : index
    %6 = vector.load %arg3[%c0_5, %c0_6, %c0_7] : memref<4x1x8xf32, #tpu.memory_space<vmem>>, vector<1x1x8xf32>
    %7 = vector.shape_cast %6 : vector<1x1x8xf32> to vector<1x8xf32>
    %8 = vector.broadcast %7 : vector<1x8xf32> to vector<8x8xf32>
    %9 = arith.addf %5, %8 : vector<8x8xf32>
    %c0_8 = arith.constant 0 : index
    %c0_9 = arith.constant 0 : index
    %10 = vector.load %arg19[%c0_8, %c0_9] : memref<8x8xf32, #tpu.memory_space<vmem>>, vector<8x8xf32>
    tpu.vector_store %arg19[%c0_8, %c0_9], %9 {strides = array<i32>} : memref<8x8xf32, #tpu.memory_space<vmem>>, vector<8x8xf32>,
    %c0_10 = arith.constant 0 : index
    %c0_11 = arith.constant 0 : index
    %11 = vector.load %arg19[%c0_10, %c0_11] : memref<8x8xf32, #tpu.memory_space<vmem>>, vector<2x8xf32>
    %c0_12 = arith.constant 0 : index
    %c0_13 = arith.constant 0 : index
    %c0_14 = arith.constant 0 : index
    %12 = vector.load %arg20[%c0_12, %c0_13, %c0_14] : memref<4x8x8xf32, #tpu.memory_space<vmem>>, vector<1x2x8xf32>
    %13 = vector.shape_cast %12 : vector<1x2x8xf32> to vector<2x8xf32>
    %14 = vector.shape_cast %11 : vector<2x8xf32> to vector<1x2x8xf32>
    tpu.vector_store %arg20[%c0_12, %c0_13, %c0_14], %14 {strides = array<i32>} : memref<4x8x8xf32, #tpu.memory_space<vmem>>, vector<1x2x8xf32>,
    %c2 = arith.constant 2 : index
    %c0_15 = arith.constant 0 : index
    %15 = vector.load %arg19[%c2, %c0_15] : memref<8x8xf32, #tpu.memory_space<vmem>>, vector<2x8xf32>
    %c1 = arith.constant 1 : index
    %c0_16 = arith.constant 0 : index
    %c0_17 = arith.constant 0 : index
    %16 = vector.load %arg20[%c1, %c0_16, %c0_17] : memref<4x8x8xf32, #tpu.memory_space<vmem>>, vector<1x2x8xf32>
    %17 = vector.shape_cast %16 : vector<1x2x8xf32> to vector<2x8xf32>
    %18 = vector.shape_cast %15 : vector<2x8xf32> to vector<1x2x8xf32>
    tpu.vector_store %arg20[%c1, %c0_16, %c0_17], %18 {strides = array<i32>} : memref<4x8x8xf32, #tpu.memory_space<vmem>>, vector<1x2x8xf32>,
    %c4 = arith.constant 4 : index
    %c0_18 = arith.constant 0 : index
    %19 = vector.load %arg19[%c4, %c0_18] : memref<8x8xf32, #tpu.memory_space<vmem>>, vector<2x8xf32>
    %c2_19 = arith.constant 2 : index
    %c0_20 = arith.constant 0 : index
    %c0_21 = arith.constant 0 : index
    %20 = vector.load %arg20[%c2_19, %c0_20, %c0_21] : memref<4x8x8xf32, #tpu.memory_space<vmem>>, vector<1x2x8xf32>
    %21 = vector.shape_cast %20 : vector<1x2x8xf32> to vector<2x8xf32>
    %22 = vector.shape_cast %19 : vector<2x8xf32> to vector<1x2x8xf32>
    tpu.vector_store %arg20[%c2_19, %c0_20, %c0_21], %22 {strides = array<i32>} : memref<4x8x8xf32, #tpu.memory_space<vmem>>, vector<1x2x8xf32>,
    %c6 = arith.constant 6 : index
    %c0_22 = arith.constant 0 : index
    %23 = vector.load %arg19[%c6, %c0_22] : memref<8x8xf32, #tpu.memory_space<vmem>>, vector<2x8xf32>
    %c3 = arith.constant 3 : index
    %c0_23 = arith.constant 0 : index
    %c0_24 = arith.constant 0 : index
    %24 = vector.load %arg20[%c3, %c0_23, %c0_24] : memref<4x8x8xf32, #tpu.memory_space<vmem>>, vector<1x2x8xf32>
    %25 = vector.shape_cast %24 : vector<1x2x8xf32> to vector<2x8xf32>
    %26 = vector.shape_cast %23 : vector<2x8xf32> to vector<1x2x8xf32>
    tpu.vector_store %arg20[%c3, %c0_23, %c0_24], %26 {strides = array<i32>} : memref<4x8x8xf32, #tpu.memory_space<vmem>>, vector<1x2x8xf32>,
    %c1_25 = arith.constant 1 : index
    %c0_26 = arith.constant 0 : index
    %c0_27 = arith.constant 0 : index
    %27 = vector.load %arg2[%c1_25, %c0_26, %c0_27] : memref<4x32x8xbf16, #tpu.memory_space<vmem>>, vector<1x32x8xbf16>
    %28 = vector.shape_cast %27 : vector<1x32x8xbf16> to vector<32x8xbf16>
    %cst_28 = arith.constant dense<0.000000e+00> : vector<8x8xf32>
    %29 = tpu.matmul %2, %28, %cst_28 {dimension_numbers = #tpu.dot_dimension_numbers<[1], [0], [0], [1], [0, 0, 1, 1], [], []>} : vector<8x32xbf16>, vector<32x8xbf16>, vector<8x8xf32> -> vector<8x8xf32>
    %c1_29 = arith.constant 1 : index
    %c0_30 = arith.constant 0 : index
    %c0_31 = arith.constant 0 : index
    %30 = vector.load %arg3[%c1_29, %c0_30, %c0_31] : memref<4x1x8xf32, #tpu.memory_space<vmem>>, vector<1x1x8xf32>
    %31 = vector.shape_cast %30 : vector<1x1x8xf32> to vector<1x8xf32>
    %32 = vector.broadcast %31 : vector<1x8xf32> to vector<8x8xf32>
    %33 = arith.addf %29, %32 : vector<8x8xf32>
    %c0_32 = arith.constant 0 : index
    %c0_33 = arith.constant 0 : index
    %34 = vector.load %arg19[%c0_32, %c0_33] : memref<8x8xf32, #tpu.memory_space<vmem>>, vector<8x8xf32>
    tpu.vector_store %arg19[%c0_32, %c0_33], %33 {strides = array<i32>} : memref<8x8xf32, #tpu.memory_space<vmem>>, vector<8x8xf32>,
    %c0_34 = arith.constant 0 : index
    %c0_35 = arith.constant 0 : index
    %35 = vector.load %arg19[%c0_34, %c0_35] : memref<8x8xf32, #tpu.memory_space<vmem>>, vector<2x8xf32>
    %c0_36 = arith.constant 0 : index
    %c2_37 = arith.constant 2 : index
    %c0_38 = arith.constant 0 : index
    %36 = vector.load %arg20[%c0_36, %c2_37, %c0_38] : memref<4x8x8xf32, #tpu.memory_space<vmem>>, vector<1x2x8xf32>
    %37 = vector.shape_cast %36 : vector<1x2x8xf32> to vector<2x8xf32>
    %38 = vector.shape_cast %35 : vector<2x8xf32> to vector<1x2x8xf32>
    tpu.vector_store %arg20[%c0_36, %c2_37, %c0_38], %38 {strides = array<i32>} : memref<4x8x8xf32, #tpu.memory_space<vmem>>, vector<1x2x8xf32>,
    %c2_39 = arith.constant 2 : index
    %c0_40 = arith.constant 0 : index
    %39 = vector.load %arg19[%c2_39, %c0_40] : memref<8x8xf32, #tpu.memory_space<vmem>>, vector<2x8xf32>
    %c1_41 = arith.constant 1 : index
    %c2_42 = arith.constant 2 : index
    %c0_43 = arith.constant 0 : index
    %40 = vector.load %arg20[%c1_41, %c2_42, %c0_43] : memref<4x8x8xf32, #tpu.memory_space<vmem>>, vector<1x2x8xf32>
    %41 = vector.shape_cast %40 : vector<1x2x8xf32> to vector<2x8xf32>
    %42 = vector.shape_cast %39 : vector<2x8xf32> to vector<1x2x8xf32>
    tpu.vector_store %arg20[%c1_41, %c2_42, %c0_43], %42 {strides = array<i32>} : memref<4x8x8xf32, #tpu.memory_space<vmem>>, vector<1x2x8xf32>,
    %c4_44 = arith.constant 4 : index
    %c0_45 = arith.constant 0 : index
    %43 = vector.load %arg19[%c4_44, %c0_45] : memref<8x8xf32, #tpu.memory_space<vmem>>, vector<2x8xf32>
    %c2_46 = arith.constant 2 : index
    %c2_47 = arith.constant 2 : index
    %c0_48 = arith.constant 0 : index
    %44 = vector.load %arg20[%c2_46, %c2_47, %c0_48] : memref<4x8x8xf32, #tpu.memory_space<vmem>>, vector<1x2x8xf32>
    %45 = vector.shape_cast %44 : vector<1x2x8xf32> to vector<2x8xf32>
    %46 = vector.shape_cast %43 : vector<2x8xf32> to vector<1x2x8xf32>
    tpu.vector_store %arg20[%c2_46, %c2_47, %c0_48], %46 {strides = array<i32>} : memref<4x8x8xf32, #tpu.memory_space<vmem>>, vector<1x2x8xf32>,
    %c6_49 = arith.constant 6 : index
    %c0_50 = arith.constant 0 : index
    %47 = vector.load %arg19[%c6_49, %c0_50] : memref<8x8xf32, #tpu.memory_space<vmem>>, vector<2x8xf32>
    %c3_51 = arith.constant 3 : index
    %c2_52 = arith.constant 2 : index
    %c0_53 = arith.constant 0 : index
    %48 = vector.load %arg20[%c3_51, %c2_52, %c0_53] : memref<4x8x8xf32, #tpu.memory_space<vmem>>, vector<1x2x8xf32>
    %49 = vector.shape_cast %48 : vector<1x2x8xf32> to vector<2x8xf32>
    %50 = vector.shape_cast %47 : vector<2x8xf32> to vector<1x2x8xf32>
    tpu.vector_store %arg20[%c3_51, %c2_52, %c0_53], %50 {strides = array<i32>} : memref<4x8x8xf32, #tpu.memory_space<vmem>>, vector<1x2x8xf32>,
    %c2_54 = arith.constant 2 : index
    %c0_55 = arith.constant 0 : index
    %c0_56 = arith.constant 0 : index
    %51 = vector.load %arg2[%c2_54, %c0_55, %c0_56] : memref<4x32x8xbf16, #tpu.memory_space<vmem>>, vector<1x32x8xbf16>
    %52 = vector.shape_cast %51 : vector<1x32x8xbf16> to vector<32x8xbf16>
    %cst_57 = arith.constant dense<0.000000e+00> : vector<8x8xf32>
    %53 = tpu.matmul %2, %52, %cst_57 {dimension_numbers = #tpu.dot_dimension_numbers<[1], [0], [0], [1], [0, 0, 1, 1], [], []>} : vector<8x32xbf16>, vector<32x8xbf16>, vector<8x8xf32> -> vector<8x8xf32>
    %c2_58 = arith.constant 2 : index
    %c0_59 = arith.constant 0 : index
    %c0_60 = arith.constant 0 : index
    %54 = vector.load %arg3[%c2_58, %c0_59, %c0_60] : memref<4x1x8xf32, #tpu.memory_space<vmem>>, vector<1x1x8xf32>
    %55 = vector.shape_cast %54 : vector<1x1x8xf32> to vector<1x8xf32>
    %56 = vector.broadcast %55 : vector<1x8xf32> to vector<8x8xf32>
    %57 = arith.addf %53, %56 : vector<8x8xf32>
    %c0_61 = arith.constant 0 : index
    %c0_62 = arith.constant 0 : index
    %58 = vector.load %arg19[%c0_61, %c0_62] : memref<8x8xf32, #tpu.memory_space<vmem>>, vector<8x8xf32>
    tpu.vector_store %arg19[%c0_61, %c0_62], %57 {strides = array<i32>} : memref<8x8xf32, #tpu.memory_space<vmem>>, vector<8x8xf32>,
    %c0_63 = arith.constant 0 : index
    %c0_64 = arith.constant 0 : index
    %59 = vector.load %arg19[%c0_63, %c0_64] : memref<8x8xf32, #tpu.memory_space<vmem>>, vector<2x8xf32>
    %c0_65 = arith.constant 0 : index
    %c4_66 = arith.constant 4 : index
    %c0_67 = arith.constant 0 : index
    %60 = vector.load %arg20[%c0_65, %c4_66, %c0_67] : memref<4x8x8xf32, #tpu.memory_space<vmem>>, vector<1x2x8xf32>
    %61 = vector.shape_cast %60 : vector<1x2x8xf32> to vector<2x8xf32>
    %62 = vector.shape_cast %59 : vector<2x8xf32> to vector<1x2x8xf32>
    tpu.vector_store %arg20[%c0_65, %c4_66, %c0_67], %62 {strides = array<i32>} : memref<4x8x8xf32, #tpu.memory_space<vmem>>, vector<1x2x8xf32>,
    %c2_68 = arith.constant 2 : index
    %c0_69 = arith.constant 0 : index
    %63 = vector.load %arg19[%c2_68, %c0_69] : memref<8x8xf32, #tpu.memory_space<vmem>>, vector<2x8xf32>
    %c1_70 = arith.constant 1 : index
    %c4_71 = arith.constant 4 : index
    %c0_72 = arith.constant 0 : index
    %64 = vector.load %arg20[%c1_70, %c4_71, %c0_72] : memref<4x8x8xf32, #tpu.memory_space<vmem>>, vector<1x2x8xf32>
    %65 = vector.shape_cast %64 : vector<1x2x8xf32> to vector<2x8xf32>
    %66 = vector.shape_cast %63 : vector<2x8xf32> to vector<1x2x8xf32>
    tpu.vector_store %arg20[%c1_70, %c4_71, %c0_72], %66 {strides = array<i32>} : memref<4x8x8xf32, #tpu.memory_space<vmem>>, vector<1x2x8xf32>,
    %c4_73 = arith.constant 4 : index
    %c0_74 = arith.constant 0 : index
    %67 = vector.load %arg19[%c4_73, %c0_74] : memref<8x8xf32, #tpu.memory_space<vmem>>, vector<2x8xf32>
    %c2_75 = arith.constant 2 : index
    %c4_76 = arith.constant 4 : index
    %c0_77 = arith.constant 0 : index
    %68 = vector.load %arg20[%c2_75, %c4_76, %c0_77] : memref<4x8x8xf32, #tpu.memory_space<vmem>>, vector<1x2x8xf32>
    %69 = vector.shape_cast %68 : vector<1x2x8xf32> to vector<2x8xf32>
    %70 = vector.shape_cast %67 : vector<2x8xf32> to vector<1x2x8xf32>
    tpu.vector_store %arg20[%c2_75, %c4_76, %c0_77], %70 {strides = array<i32>} : memref<4x8x8xf32, #tpu.memory_space<vmem>>, vector<1x2x8xf32>,
    %c6_78 = arith.constant 6 : index
    %c0_79 = arith.constant 0 : index
    %71 = vector.load %arg19[%c6_78, %c0_79] : memref<8x8xf32, #tpu.memory_space<vmem>>, vector<2x8xf32>
    %c3_80 = arith.constant 3 : index
    %c4_81 = arith.constant 4 : index
    %c0_82 = arith.constant 0 : index
    %72 = vector.load %arg20[%c3_80, %c4_81, %c0_82] : memref<4x8x8xf32, #tpu.memory_space<vmem>>, vector<1x2x8xf32>
    %73 = vector.shape_cast %72 : vector<1x2x8xf32> to vector<2x8xf32>
    %74 = vector.shape_cast %71 : vector<2x8xf32> to vector<1x2x8xf32>
    tpu.vector_store %arg20[%c3_80, %c4_81, %c0_82], %74 {strides = array<i32>} : memref<4x8x8xf32, #tpu.memory_space<vmem>>, vector<1x2x8xf32>,
    %c3_83 = arith.constant 3 : index
    %c0_84 = arith.constant 0 : index
    %c0_85 = arith.constant 0 : index
    %75 = vector.load %arg2[%c3_83, %c0_84, %c0_85] : memref<4x32x8xbf16, #tpu.memory_space<vmem>>, vector<1x32x8xbf16>
    %76 = vector.shape_cast %75 : vector<1x32x8xbf16> to vector<32x8xbf16>
    %cst_86 = arith.constant dense<0.000000e+00> : vector<8x8xf32>
    %77 = tpu.matmul %2, %76, %cst_86 {dimension_numbers = #tpu.dot_dimension_numbers<[1], [0], [0], [1], [0, 0, 1, 1], [], []>} : vector<8x32xbf16>, vector<32x8xbf16>, vector<8x8xf32> -> vector<8x8xf32>
    %c3_87 = arith.constant 3 : index
    %c0_88 = arith.constant 0 : index
    %c0_89 = arith.constant 0 : index
    %78 = vector.load %arg3[%c3_87, %c0_88, %c0_89] : memref<4x1x8xf32, #tpu.memory_space<vmem>>, vector<1x1x8xf32>
    %79 = vector.shape_cast %78 : vector<1x1x8xf32> to vector<1x8xf32>
    %80 = vector.broadcast %79 : vector<1x8xf32> to vector<8x8xf32>
    %81 = arith.addf %77, %80 : vector<8x8xf32>
    %c0_90 = arith.constant 0 : index
    %c0_91 = arith.constant 0 : index
    %82 = vector.load %arg19[%c0_90, %c0_91] : memref<8x8xf32, #tpu.memory_space<vmem>>, vector<8x8xf32>
    tpu.vector_store %arg19[%c0_90, %c0_91], %81 {strides = array<i32>} : memref<8x8xf32, #tpu.memory_space<vmem>>, vector<8x8xf32>,
    %c0_92 = arith.constant 0 : index
    %c0_93 = arith.constant 0 : index
    %83 = vector.load %arg19[%c0_92, %c0_93] : memref<8x8xf32, #tpu.memory_space<vmem>>, vector<2x8xf32>
    %c0_94 = arith.constant 0 : index
    %c6_95 = arith.constant 6 : index
    %c0_96 = arith.constant 0 : index
    %84 = vector.load %arg20[%c0_94, %c6_95, %c0_96] : memref<4x8x8xf32, #tpu.memory_space<vmem>>, vector<1x2x8xf32>
    %85 = vector.shape_cast %84 : vector<1x2x8xf32> to vector<2x8xf32>
    %86 = vector.shape_cast %83 : vector<2x8xf32> to vector<1x2x8xf32>
    tpu.vector_store %arg20[%c0_94, %c6_95, %c0_96], %86 {strides = array<i32>} : memref<4x8x8xf32, #tpu.memory_space<vmem>>, vector<1x2x8xf32>,
    %c2_97 = arith.constant 2 : index
    %c0_98 = arith.constant 0 : index
    %87 = vector.load %arg19[%c2_97, %c0_98] : memref<8x8xf32, #tpu.memory_space<vmem>>, vector<2x8xf32>
    %c1_99 = arith.constant 1 : index
    %c6_100 = arith.constant 6 : index
    %c0_101 = arith.constant 0 : index
    %88 = vector.load %arg20[%c1_99, %c6_100, %c0_101] : memref<4x8x8xf32, #tpu.memory_space<vmem>>, vector<1x2x8xf32>
    %89 = vector.shape_cast %88 : vector<1x2x8xf32> to vector<2x8xf32>
    %90 = vector.shape_cast %87 : vector<2x8xf32> to vector<1x2x8xf32>
    tpu.vector_store %arg20[%c1_99, %c6_100, %c0_101], %90 {strides = array<i32>} : memref<4x8x8xf32, #tpu.memory_space<vmem>>, vector<1x2x8xf32>,
    %c4_102 = arith.constant 4 : index
    %c0_103 = arith.constant 0 : index
    %91 = vector.load %arg19[%c4_102, %c0_103] : memref<8x8xf32, #tpu.memory_space<vmem>>, vector<2x8xf32>
    %c2_104 = arith.constant 2 : index
    %c6_105 = arith.constant 6 : index
    %c0_106 = arith.constant 0 : index
    %92 = vector.load %arg20[%c2_104, %c6_105, %c0_106] : memref<4x8x8xf32, #tpu.memory_space<vmem>>, vector<1x2x8xf32>
    %93 = vector.shape_cast %92 : vector<1x2x8xf32> to vector<2x8xf32>
    %94 = vector.shape_cast %91 : vector<2x8xf32> to vector<1x2x8xf32>
    tpu.vector_store %arg20[%c2_104, %c6_105, %c0_106], %94 {strides = array<i32>} : memref<4x8x8xf32, #tpu.memory_space<vmem>>, vector<1x2x8xf32>,
    %c6_107 = arith.constant 6 : index
    %c0_108 = arith.constant 0 : index
    %95 = vector.load %arg19[%c6_107, %c0_108] : memref<8x8xf32, #tpu.memory_space<vmem>>, vector<2x8xf32>
    %c3_109 = arith.constant 3 : index
    %c6_110 = arith.constant 6 : index
    %c0_111 = arith.constant 0 : index
    %96 = vector.load %arg20[%c3_109, %c6_110, %c0_111] : memref<4x8x8xf32, #tpu.memory_space<vmem>>, vector<1x2x8xf32>
    %97 = vector.shape_cast %96 : vector<1x2x8xf32> to vector<2x8xf32>
    %98 = vector.shape_cast %95 : vector<2x8xf32> to vector<1x2x8xf32>
    tpu.vector_store %arg20[%c3_109, %c6_110, %c0_111], %98 {strides = array<i32>} : memref<4x8x8xf32, #tpu.memory_space<vmem>>, vector<1x2x8xf32>,
    %c0_112 = arith.constant 0 : index
    %c0_113 = arith.constant 0 : index
    %c0_114 = arith.constant 0 : index
    %99 = vector.load %arg4[%c0_112, %c0_113, %c0_114] : memref<4x32x8xbf16, #tpu.memory_space<vmem>>, vector<1x32x8xbf16>
    %100 = vector.shape_cast %99 : vector<1x32x8xbf16> to vector<32x8xbf16>
    %cst_115 = arith.constant dense<0.000000e+00> : vector<8x8xf32>
    %101 = tpu.matmul %2, %100, %cst_115 {dimension_numbers = #tpu.dot_dimension_numbers<[1], [0], [0], [1], [0, 0, 1, 1], [], []>} : vector<8x32xbf16>, vector<32x8xbf16>, vector<8x8xf32> -> vector<8x8xf32>
    %c0_116 = arith.constant 0 : index
    %c0_117 = arith.constant 0 : index
    %c0_118 = arith.constant 0 : index
    %102 = vector.load %arg5[%c0_116, %c0_117, %c0_118] : memref<4x1x8xf32, #tpu.memory_space<vmem>>, vector<1x1x8xf32>
    %103 = vector.shape_cast %102 : vector<1x1x8xf32> to vector<1x8xf32>
    %104 = vector.broadcast %103 : vector<1x8xf32> to vector<8x8xf32>
    %105 = arith.addf %101, %104 : vector<8x8xf32>
    %c0_119 = arith.constant 0 : index
    %c0_120 = arith.constant 0 : index
    %106 = vector.load %arg19[%c0_119, %c0_120] : memref<8x8xf32, #tpu.memory_space<vmem>>, vector<8x8xf32>
    tpu.vector_store %arg19[%c0_119, %c0_120], %105 {strides = array<i32>} : memref<8x8xf32, #tpu.memory_space<vmem>>, vector<8x8xf32>,
    %c0_121 = arith.constant 0 : index
    %c0_122 = arith.constant 0 : index
    %107 = vector.load %arg19[%c0_121, %c0_122] : memref<8x8xf32, #tpu.memory_space<vmem>>, vector<2x8xf32>
    %c0_123 = arith.constant 0 : index
    %c0_124 = arith.constant 0 : index
    %c0_125 = arith.constant 0 : index
    %108 = vector.load %arg21[%c0_123, %c0_124, %c0_125] : memref<4x8x8xf32, #tpu.memory_space<vmem>>, vector<1x2x8xf32>
    %109 = vector.shape_cast %108 : vector<1x2x8xf32> to vector<2x8xf32>
    %110 = vector.shape_cast %107 : vector<2x8xf32> to vector<1x2x8xf32>
    tpu.vector_store %arg21[%c0_123, %c0_124, %c0_125], %110 {strides = array<i32>} : memref<4x8x8xf32, #tpu.memory_space<vmem>>, vector<1x2x8xf32>,
    %c2_126 = arith.constant 2 : index
    %c0_127 = arith.constant 0 : index
    %111 = vector.load %arg19[%c2_126, %c0_127] : memref<8x8xf32, #tpu.memory_space<vmem>>, vector<2x8xf32>
    %c1_128 = arith.constant 1 : index
    %c0_129 = arith.constant 0 : index
    %c0_130 = arith.constant 0 : index
    %112 = vector.load %arg21[%c1_128, %c0_129, %c0_130] : memref<4x8x8xf32, #tpu.memory_space<vmem>>, vector<1x2x8xf32>
    %113 = vector.shape_cast %112 : vector<1x2x8xf32> to vector<2x8xf32>
    %114 = vector.shape_cast %111 : vector<2x8xf32> to vector<1x2x8xf32>
    tpu.vector_store %arg21[%c1_128, %c0_129, %c0_130], %114 {strides = array<i32>} : memref<4x8x8xf32, #tpu.memory_space<vmem>>, vector<1x2x8xf32>,
    %c4_131 = arith.constant 4 : index
    %c0_132 = arith.constant 0 : index
    %115 = vector.load %arg19[%c4_131, %c0_132] : memref<8x8xf32, #tpu.memory_space<vmem>>, vector<2x8xf32>
    %c2_133 = arith.constant 2 : index
    %c0_134 = arith.constant 0 : index
    %c0_135 = arith.constant 0 : index
    %116 = vector.load %arg21[%c2_133, %c0_134, %c0_135] : memref<4x8x8xf32, #tpu.memory_space<vmem>>, vector<1x2x8xf32>
    %117 = vector.shape_cast %116 : vector<1x2x8xf32> to vector<2x8xf32>
    %118 = vector.shape_cast %115 : vector<2x8xf32> to vector<1x2x8xf32>
    tpu.vector_store %arg21[%c2_133, %c0_134, %c0_135], %118 {strides = array<i32>} : memref<4x8x8xf32, #tpu.memory_space<vmem>>, vector<1x2x8xf32>,
    %c6_136 = arith.constant 6 : index
    %c0_137 = arith.constant 0 : index
    %119 = vector.load %arg19[%c6_136, %c0_137] : memref<8x8xf32, #tpu.memory_space<vmem>>, vector<2x8xf32>
    %c3_138 = arith.constant 3 : index
    %c0_139 = arith.constant 0 : index
    %c0_140 = arith.constant 0 : index
    %120 = vector.load %arg21[%c3_138, %c0_139, %c0_140] : memref<4x8x8xf32, #tpu.memory_space<vmem>>, vector<1x2x8xf32>
    %121 = vector.shape_cast %120 : vector<1x2x8xf32> to vector<2x8xf32>
    %122 = vector.shape_cast %119 : vector<2x8xf32> to vector<1x2x8xf32>
    tpu.vector_store %arg21[%c3_138, %c0_139, %c0_140], %122 {strides = array<i32>} : memref<4x8x8xf32, #tpu.memory_space<vmem>>, vector<1x2x8xf32>,
    %c1_141 = arith.constant 1 : index
    %c0_142 = arith.constant 0 : index
    %c0_143 = arith.constant 0 : index
    %123 = vector.load %arg4[%c1_141, %c0_142, %c0_143] : memref<4x32x8xbf16, #tpu.memory_space<vmem>>, vector<1x32x8xbf16>
    %124 = vector.shape_cast %123 : vector<1x32x8xbf16> to vector<32x8xbf16>
    %cst_144 = arith.constant dense<0.000000e+00> : vector<8x8xf32>
    %125 = tpu.matmul %2, %124, %cst_144 {dimension_numbers = #tpu.dot_dimension_numbers<[1], [0], [0], [1], [0, 0, 1, 1], [], []>} : vector<8x32xbf16>, vector<32x8xbf16>, vector<8x8xf32> -> vector<8x8xf32>
    %c1_145 = arith.constant 1 : index
    %c0_146 = arith.constant 0 : index
    %c0_147 = arith.constant 0 : index
    %126 = vector.load %arg5[%c1_145, %c0_146, %c0_147] : memref<4x1x8xf32, #tpu.memory_space<vmem>>, vector<1x1x8xf32>
    %127 = vector.shape_cast %126 : vector<1x1x8xf32> to vector<1x8xf32>
    %128 = vector.broadcast %127 : vector<1x8xf32> to vector<8x8xf32>
    %129 = arith.addf %125, %128 : vector<8x8xf32>
    %c0_148 = arith.constant 0 : index
    %c0_149 = arith.constant 0 : index
    %130 = vector.load %arg19[%c0_148, %c0_149] : memref<8x8xf32, #tpu.memory_space<vmem>>, vector<8x8xf32>
    tpu.vector_store %arg19[%c0_148, %c0_149], %129 {strides = array<i32>} : memref<8x8xf32, #tpu.memory_space<vmem>>, vector<8x8xf32>,
    %c0_150 = arith.constant 0 : index
    %c0_151 = arith.constant 0 : index
    %131 = vector.load %arg19[%c0_150, %c0_151] : memref<8x8xf32, #tpu.memory_space<vmem>>, vector<2x8xf32>
    %c0_152 = arith.constant 0 : index
    %c2_153 = arith.constant 2 : index
    %c0_154 = arith.constant 0 : index
    %132 = vector.load %arg21[%c0_152, %c2_153, %c0_154] : memref<4x8x8xf32, #tpu.memory_space<vmem>>, vector<1x2x8xf32>
    %133 = vector.shape_cast %132 : vector<1x2x8xf32> to vector<2x8xf32>
    %134 = vector.shape_cast %131 : vector<2x8xf32> to vector<1x2x8xf32>
    tpu.vector_store %arg21[%c0_152, %c2_153, %c0_154], %134 {strides = array<i32>} : memref<4x8x8xf32, #tpu.memory_space<vmem>>, vector<1x2x8xf32>,
    %c2_155 = arith.constant 2 : index
    %c0_156 = arith.constant 0 : index
    %135 = vector.load %arg19[%c2_155, %c0_156] : memref<8x8xf32, #tpu.memory_space<vmem>>, vector<2x8xf32>
    %c1_157 = arith.constant 1 : index
    %c2_158 = arith.constant 2 : index
    %c0_159 = arith.constant 0 : index
    %136 = vector.load %arg21[%c1_157, %c2_158, %c0_159] : memref<4x8x8xf32, #tpu.memory_space<vmem>>, vector<1x2x8xf32>
    %137 = vector.shape_cast %136 : vector<1x2x8xf32> to vector<2x8xf32>
    %138 = vector.shape_cast %135 : vector<2x8xf32> to vector<1x2x8xf32>
    tpu.vector_store %arg21[%c1_157, %c2_158, %c0_159], %138 {strides = array<i32>} : memref<4x8x8xf32, #tpu.memory_space<vmem>>, vector<1x2x8xf32>,
    %c4_160 = arith.constant 4 : index
    %c0_161 = arith.constant 0 : index
    %139 = vector.load %arg19[%c4_160, %c0_161] : memref<8x8xf32, #tpu.memory_space<vmem>>, vector<2x8xf32>
    %c2_162 = arith.constant 2 : index
    %c2_163 = arith.constant 2 : index
    %c0_164 = arith.constant 0 : index
    %140 = vector.load %arg21[%c2_162, %c2_163, %c0_164] : memref<4x8x8xf32, #tpu.memory_space<vmem>>, vector<1x2x8xf32>
    %141 = vector.shape_cast %140 : vector<1x2x8xf32> to vector<2x8xf32>
    %142 = vector.shape_cast %139 : vector<2x8xf32> to vector<1x2x8xf32>
    tpu.vector_store %arg21[%c2_162, %c2_163, %c0_164], %142 {strides = array<i32>} : memref<4x8x8xf32, #tpu.memory_space<vmem>>, vector<1x2x8xf32>,
    %c6_165 = arith.constant 6 : index
    %c0_166 = arith.constant 0 : index
    %143 = vector.load %arg19[%c6_165, %c0_166] : memref<8x8xf32, #tpu.memory_space<vmem>>, vector<2x8xf32>
    %c3_167 = arith.constant 3 : index
    %c2_168 = arith.constant 2 : index
    %c0_169 = arith.constant 0 : index
    %144 = vector.load %arg21[%c3_167, %c2_168, %c0_169] : memref<4x8x8xf32, #tpu.memory_space<vmem>>, vector<1x2x8xf32>
    %145 = vector.shape_cast %144 : vector<1x2x8xf32> to vector<2x8xf32>
    %146 = vector.shape_cast %143 : vector<2x8xf32> to vector<1x2x8xf32>
    tpu.vector_store %arg21[%c3_167, %c2_168, %c0_169], %146 {strides = array<i32>} : memref<4x8x8xf32, #tpu.memory_space<vmem>>, vector<1x2x8xf32>,
    %c2_170 = arith.constant 2 : index
    %c0_171 = arith.constant 0 : index
    %c0_172 = arith.constant 0 : index
    %147 = vector.load %arg4[%c2_170, %c0_171, %c0_172] : memref<4x32x8xbf16, #tpu.memory_space<vmem>>, vector<1x32x8xbf16>
    %148 = vector.shape_cast %147 : vector<1x32x8xbf16> to vector<32x8xbf16>
    %cst_173 = arith.constant dense<0.000000e+00> : vector<8x8xf32>
    %149 = tpu.matmul %2, %148, %cst_173 {dimension_numbers = #tpu.dot_dimension_numbers<[1], [0], [0], [1], [0, 0, 1, 1], [], []>} : vector<8x32xbf16>, vector<32x8xbf16>, vector<8x8xf32> -> vector<8x8xf32>
    %c2_174 = arith.constant 2 : index
    %c0_175 = arith.constant 0 : index
    %c0_176 = arith.constant 0 : index
    %150 = vector.load %arg5[%c2_174, %c0_175, %c0_176] : memref<4x1x8xf32, #tpu.memory_space<vmem>>, vector<1x1x8xf32>
    %151 = vector.shape_cast %150 : vector<1x1x8xf32> to vector<1x8xf32>
    %152 = vector.broadcast %151 : vector<1x8xf32> to vector<8x8xf32>
    %153 = arith.addf %149, %152 : vector<8x8xf32>
    %c0_177 = arith.constant 0 : index
    %c0_178 = arith.constant 0 : index
    %154 = vector.load %arg19[%c0_177, %c0_178] : memref<8x8xf32, #tpu.memory_space<vmem>>, vector<8x8xf32>
    tpu.vector_store %arg19[%c0_177, %c0_178], %153 {strides = array<i32>} : memref<8x8xf32, #tpu.memory_space<vmem>>, vector<8x8xf32>,
    %c0_179 = arith.constant 0 : index
    %c0_180 = arith.constant 0 : index
    %155 = vector.load %arg19[%c0_179, %c0_180] : memref<8x8xf32, #tpu.memory_space<vmem>>, vector<2x8xf32>
    %c0_181 = arith.constant 0 : index
    %c4_182 = arith.constant 4 : index
    %c0_183 = arith.constant 0 : index
    %156 = vector.load %arg21[%c0_181, %c4_182, %c0_183] : memref<4x8x8xf32, #tpu.memory_space<vmem>>, vector<1x2x8xf32>
    %157 = vector.shape_cast %156 : vector<1x2x8xf32> to vector<2x8xf32>
    %158 = vector.shape_cast %155 : vector<2x8xf32> to vector<1x2x8xf32>
    tpu.vector_store %arg21[%c0_181, %c4_182, %c0_183], %158 {strides = array<i32>} : memref<4x8x8xf32, #tpu.memory_space<vmem>>, vector<1x2x8xf32>,
    %c2_184 = arith.constant 2 : index
    %c0_185 = arith.constant 0 : index
    %159 = vector.load %arg19[%c2_184, %c0_185] : memref<8x8xf32, #tpu.memory_space<vmem>>, vector<2x8xf32>
    %c1_186 = arith.constant 1 : index
    %c4_187 = arith.constant 4 : index
    %c0_188 = arith.constant 0 : index
    %160 = vector.load %arg21[%c1_186, %c4_187, %c0_188] : memref<4x8x8xf32, #tpu.memory_space<vmem>>, vector<1x2x8xf32>
    %161 = vector.shape_cast %160 : vector<1x2x8xf32> to vector<2x8xf32>
    %162 = vector.shape_cast %159 : vector<2x8xf32> to vector<1x2x8xf32>
    tpu.vector_store %arg21[%c1_186, %c4_187, %c0_188], %162 {strides = array<i32>} : memref<4x8x8xf32, #tpu.memory_space<vmem>>, vector<1x2x8xf32>,
    %c4_189 = arith.constant 4 : index
    %c0_190 = arith.constant 0 : index
    %163 = vector.load %arg19[%c4_189, %c0_190] : memref<8x8xf32, #tpu.memory_space<vmem>>, vector<2x8xf32>
    %c2_191 = arith.constant 2 : index
    %c4_192 = arith.constant 4 : index
    %c0_193 = arith.constant 0 : index
    %164 = vector.load %arg21[%c2_191, %c4_192, %c0_193] : memref<4x8x8xf32, #tpu.memory_space<vmem>>, vector<1x2x8xf32>
    %165 = vector.shape_cast %164 : vector<1x2x8xf32> to vector<2x8xf32>
    %166 = vector.shape_cast %163 : vector<2x8xf32> to vector<1x2x8xf32>
    tpu.vector_store %arg21[%c2_191, %c4_192, %c0_193], %166 {strides = array<i32>} : memref<4x8x8xf32, #tpu.memory_space<vmem>>, vector<1x2x8xf32>,
    %c6_194 = arith.constant 6 : index
    %c0_195 = arith.constant 0 : index
    %167 = vector.load %arg19[%c6_194, %c0_195] : memref<8x8xf32, #tpu.memory_space<vmem>>, vector<2x8xf32>
    %c3_196 = arith.constant 3 : index
    %c4_197 = arith.constant 4 : index
    %c0_198 = arith.constant 0 : index
    %168 = vector.load %arg21[%c3_196, %c4_197, %c0_198] : memref<4x8x8xf32, #tpu.memory_space<vmem>>, vector<1x2x8xf32>
    %169 = vector.shape_cast %168 : vector<1x2x8xf32> to vector<2x8xf32>
    %170 = vector.shape_cast %167 : vector<2x8xf32> to vector<1x2x8xf32>
    tpu.vector_store %arg21[%c3_196, %c4_197, %c0_198], %170 {strides = array<i32>} : memref<4x8x8xf32, #tpu.memory_space<vmem>>, vector<1x2x8xf32>,
    %c3_199 = arith.constant 3 : index
    %c0_200 = arith.constant 0 : index
    %c0_201 = arith.constant 0 : index
    %171 = vector.load %arg4[%c3_199, %c0_200, %c0_201] : memref<4x32x8xbf16, #tpu.memory_space<vmem>>, vector<1x32x8xbf16>
    %172 = vector.shape_cast %171 : vector<1x32x8xbf16> to vector<32x8xbf16>
    %cst_202 = arith.constant dense<0.000000e+00> : vector<8x8xf32>
    %173 = tpu.matmul %2, %172, %cst_202 {dimension_numbers = #tpu.dot_dimension_numbers<[1], [0], [0], [1], [0, 0, 1, 1], [], []>} : vector<8x32xbf16>, vector<32x8xbf16>, vector<8x8xf32> -> vector<8x8xf32>
    %c3_203 = arith.constant 3 : index
    %c0_204 = arith.constant 0 : index
    %c0_205 = arith.constant 0 : index
    %174 = vector.load %arg5[%c3_203, %c0_204, %c0_205] : memref<4x1x8xf32, #tpu.memory_space<vmem>>, vector<1x1x8xf32>
    %175 = vector.shape_cast %174 : vector<1x1x8xf32> to vector<1x8xf32>
    %176 = vector.broadcast %175 : vector<1x8xf32> to vector<8x8xf32>
    %177 = arith.addf %173, %176 : vector<8x8xf32>
    %c0_206 = arith.constant 0 : index
    %c0_207 = arith.constant 0 : index
    %178 = vector.load %arg19[%c0_206, %c0_207] : memref<8x8xf32, #tpu.memory_space<vmem>>, vector<8x8xf32>
    tpu.vector_store %arg19[%c0_206, %c0_207], %177 {strides = array<i32>} : memref<8x8xf32, #tpu.memory_space<vmem>>, vector<8x8xf32>,
    %c0_208 = arith.constant 0 : index
    %c0_209 = arith.constant 0 : index
    %179 = vector.load %arg19[%c0_208, %c0_209] : memref<8x8xf32, #tpu.memory_space<vmem>>, vector<2x8xf32>
    %c0_210 = arith.constant 0 : index
    %c6_211 = arith.constant 6 : index
    %c0_212 = arith.constant 0 : index
    %180 = vector.load %arg21[%c0_210, %c6_211, %c0_212] : memref<4x8x8xf32, #tpu.memory_space<vmem>>, vector<1x2x8xf32>
    %181 = vector.shape_cast %180 : vector<1x2x8xf32> to vector<2x8xf32>
    %182 = vector.shape_cast %179 : vector<2x8xf32> to vector<1x2x8xf32>
    tpu.vector_store %arg21[%c0_210, %c6_211, %c0_212], %182 {strides = array<i32>} : memref<4x8x8xf32, #tpu.memory_space<vmem>>, vector<1x2x8xf32>,
    %c2_213 = arith.constant 2 : index
    %c0_214 = arith.constant 0 : index
    %183 = vector.load %arg19[%c2_213, %c0_214] : memref<8x8xf32, #tpu.memory_space<vmem>>, vector<2x8xf32>
    %c1_215 = arith.constant 1 : index
    %c6_216 = arith.constant 6 : index
    %c0_217 = arith.constant 0 : index
    %184 = vector.load %arg21[%c1_215, %c6_216, %c0_217] : memref<4x8x8xf32, #tpu.memory_space<vmem>>, vector<1x2x8xf32>
    %185 = vector.shape_cast %184 : vector<1x2x8xf32> to vector<2x8xf32>
    %186 = vector.shape_cast %183 : vector<2x8xf32> to vector<1x2x8xf32>
    tpu.vector_store %arg21[%c1_215, %c6_216, %c0_217], %186 {strides = array<i32>} : memref<4x8x8xf32, #tpu.memory_space<vmem>>, vector<1x2x8xf32>,
    %c4_218 = arith.constant 4 : index
    %c0_219 = arith.constant 0 : index
    %187 = vector.load %arg19[%c4_218, %c0_219] : memref<8x8xf32, #tpu.memory_space<vmem>>, vector<2x8xf32>
    %c2_220 = arith.constant 2 : index
    %c6_221 = arith.constant 6 : index
    %c0_222 = arith.constant 0 : index
    %188 = vector.load %arg21[%c2_220, %c6_221, %c0_222] : memref<4x8x8xf32, #tpu.memory_space<vmem>>, vector<1x2x8xf32>
    %189 = vector.shape_cast %188 : vector<1x2x8xf32> to vector<2x8xf32>
    %190 = vector.shape_cast %187 : vector<2x8xf32> to vector<1x2x8xf32>
    tpu.vector_store %arg21[%c2_220, %c6_221, %c0_222], %190 {strides = array<i32>} : memref<4x8x8xf32, #tpu.memory_space<vmem>>, vector<1x2x8xf32>,
    %c6_223 = arith.constant 6 : index
    %c0_224 = arith.constant 0 : index
    %191 = vector.load %arg19[%c6_223, %c0_224] : memref<8x8xf32, #tpu.memory_space<vmem>>, vector<2x8xf32>
    %c3_225 = arith.constant 3 : index
    %c6_226 = arith.constant 6 : index
    %c0_227 = arith.constant 0 : index
    %192 = vector.load %arg21[%c3_225, %c6_226, %c0_227] : memref<4x8x8xf32, #tpu.memory_space<vmem>>, vector<1x2x8xf32>
    %193 = vector.shape_cast %192 : vector<1x2x8xf32> to vector<2x8xf32>
    %194 = vector.shape_cast %191 : vector<2x8xf32> to vector<1x2x8xf32>
    tpu.vector_store %arg21[%c3_225, %c6_226, %c0_227], %194 {strides = array<i32>} : memref<4x8x8xf32, #tpu.memory_space<vmem>>, vector<1x2x8xf32>,
    %c0_228 = arith.constant 0 : index
    %c0_229 = arith.constant 0 : index
    %c0_230 = arith.constant 0 : index
    %195 = vector.load %arg6[%c0_228, %c0_229, %c0_230] : memref<4x32x8xbf16, #tpu.memory_space<vmem>>, vector<1x32x8xbf16>
    %196 = vector.shape_cast %195 : vector<1x32x8xbf16> to vector<32x8xbf16>
    %cst_231 = arith.constant dense<0.000000e+00> : vector<8x8xf32>
    %197 = tpu.matmul %2, %196, %cst_231 {dimension_numbers = #tpu.dot_dimension_numbers<[1], [0], [0], [1], [0, 0, 1, 1], [], []>} : vector<8x32xbf16>, vector<32x8xbf16>, vector<8x8xf32> -> vector<8x8xf32>
    %c0_232 = arith.constant 0 : index
    %c0_233 = arith.constant 0 : index
    %c0_234 = arith.constant 0 : index
    %198 = vector.load %arg7[%c0_232, %c0_233, %c0_234] : memref<4x1x8xf32, #tpu.memory_space<vmem>>, vector<1x1x8xf32>
    %199 = vector.shape_cast %198 : vector<1x1x8xf32> to vector<1x8xf32>
    %200 = vector.broadcast %199 : vector<1x8xf32> to vector<8x8xf32>
    %201 = arith.addf %197, %200 : vector<8x8xf32>
    %c0_235 = arith.constant 0 : index
    %c0_236 = arith.constant 0 : index
    %202 = vector.load %arg19[%c0_235, %c0_236] : memref<8x8xf32, #tpu.memory_space<vmem>>, vector<8x8xf32>
    tpu.vector_store %arg19[%c0_235, %c0_236], %201 {strides = array<i32>} : memref<8x8xf32, #tpu.memory_space<vmem>>, vector<8x8xf32>,
    %c0_237 = arith.constant 0 : index
    %c0_238 = arith.constant 0 : index
    %203 = vector.load %arg19[%c0_237, %c0_238] : memref<8x8xf32, #tpu.memory_space<vmem>>, vector<2x8xf32>
    %c0_239 = arith.constant 0 : index
    %c0_240 = arith.constant 0 : index
    %c0_241 = arith.constant 0 : index
    %204 = vector.load %arg22[%c0_239, %c0_240, %c0_241] : memref<4x8x8xf32, #tpu.memory_space<vmem>>, vector<1x2x8xf32>
    %205 = vector.shape_cast %204 : vector<1x2x8xf32> to vector<2x8xf32>
    %206 = vector.shape_cast %203 : vector<2x8xf32> to vector<1x2x8xf32>
    tpu.vector_store %arg22[%c0_239, %c0_240, %c0_241], %206 {strides = array<i32>} : memref<4x8x8xf32, #tpu.memory_space<vmem>>, vector<1x2x8xf32>,
    %c2_242 = arith.constant 2 : index
    %c0_243 = arith.constant 0 : index
    %207 = vector.load %arg19[%c2_242, %c0_243] : memref<8x8xf32, #tpu.memory_space<vmem>>, vector<2x8xf32>
    %c1_244 = arith.constant 1 : index
    %c0_245 = arith.constant 0 : index
    %c0_246 = arith.constant 0 : index
    %208 = vector.load %arg22[%c1_244, %c0_245, %c0_246] : memref<4x8x8xf32, #tpu.memory_space<vmem>>, vector<1x2x8xf32>
    %209 = vector.shape_cast %208 : vector<1x2x8xf32> to vector<2x8xf32>
    %210 = vector.shape_cast %207 : vector<2x8xf32> to vector<1x2x8xf32>
    tpu.vector_store %arg22[%c1_244, %c0_245, %c0_246], %210 {strides = array<i32>} : memref<4x8x8xf32, #tpu.memory_space<vmem>>, vector<1x2x8xf32>,
    %c4_247 = arith.constant 4 : index
    %c0_248 = arith.constant 0 : index
    %211 = vector.load %arg19[%c4_247, %c0_248] : memref<8x8xf32, #tpu.memory_space<vmem>>, vector<2x8xf32>
    %c2_249 = arith.constant 2 : index
    %c0_250 = arith.constant 0 : index
    %c0_251 = arith.constant 0 : index
    %212 = vector.load %arg22[%c2_249, %c0_250, %c0_251] : memref<4x8x8xf32, #tpu.memory_space<vmem>>, vector<1x2x8xf32>
    %213 = vector.shape_cast %212 : vector<1x2x8xf32> to vector<2x8xf32>
    %214 = vector.shape_cast %211 : vector<2x8xf32> to vector<1x2x8xf32>
    tpu.vector_store %arg22[%c2_249, %c0_250, %c0_251], %214 {strides = array<i32>} : memref<4x8x8xf32, #tpu.memory_space<vmem>>, vector<1x2x8xf32>,
    %c6_252 = arith.constant 6 : index
    %c0_253 = arith.constant 0 : index
    %215 = vector.load %arg19[%c6_252, %c0_253] : memref<8x8xf32, #tpu.memory_space<vmem>>, vector<2x8xf32>
    %c3_254 = arith.constant 3 : index
    %c0_255 = arith.constant 0 : index
    %c0_256 = arith.constant 0 : index
    %216 = vector.load %arg22[%c3_254, %c0_255, %c0_256] : memref<4x8x8xf32, #tpu.memory_space<vmem>>, vector<1x2x8xf32>
    %217 = vector.shape_cast %216 : vector<1x2x8xf32> to vector<2x8xf32>
    %218 = vector.shape_cast %215 : vector<2x8xf32> to vector<1x2x8xf32>
    tpu.vector_store %arg22[%c3_254, %c0_255, %c0_256], %218 {strides = array<i32>} : memref<4x8x8xf32, #tpu.memory_space<vmem>>, vector<1x2x8xf32>,
    %c1_257 = arith.constant 1 : index
    %c0_258 = arith.constant 0 : index
    %c0_259 = arith.constant 0 : index
    %219 = vector.load %arg6[%c1_257, %c0_258, %c0_259] : memref<4x32x8xbf16, #tpu.memory_space<vmem>>, vector<1x32x8xbf16>
    %220 = vector.shape_cast %219 : vector<1x32x8xbf16> to vector<32x8xbf16>
    %cst_260 = arith.constant dense<0.000000e+00> : vector<8x8xf32>
    %221 = tpu.matmul %2, %220, %cst_260 {dimension_numbers = #tpu.dot_dimension_numbers<[1], [0], [0], [1], [0, 0, 1, 1], [], []>} : vector<8x32xbf16>, vector<32x8xbf16>, vector<8x8xf32> -> vector<8x8xf32>
    %c1_261 = arith.constant 1 : index
    %c0_262 = arith.constant 0 : index
    %c0_263 = arith.constant 0 : index
    %222 = vector.load %arg7[%c1_261, %c0_262, %c0_263] : memref<4x1x8xf32, #tpu.memory_space<vmem>>, vector<1x1x8xf32>
    %223 = vector.shape_cast %222 : vector<1x1x8xf32> to vector<1x8xf32>
    %224 = vector.broadcast %223 : vector<1x8xf32> to vector<8x8xf32>
    %225 = arith.addf %221, %224 : vector<8x8xf32>
    %c0_264 = arith.constant 0 : index
    %c0_265 = arith.constant 0 : index
    %226 = vector.load %arg19[%c0_264, %c0_265] : memref<8x8xf32, #tpu.memory_space<vmem>>, vector<8x8xf32>
    tpu.vector_store %arg19[%c0_264, %c0_265], %225 {strides = array<i32>} : memref<8x8xf32, #tpu.memory_space<vmem>>, vector<8x8xf32>,
    %c0_266 = arith.constant 0 : index
    %c0_267 = arith.constant 0 : index
    %227 = vector.load %arg19[%c0_266, %c0_267] : memref<8x8xf32, #tpu.memory_space<vmem>>, vector<2x8xf32>
    %c0_268 = arith.constant 0 : index
    %c2_269 = arith.constant 2 : index
    %c0_270 = arith.constant 0 : index
    %228 = vector.load %arg22[%c0_268, %c2_269, %c0_270] : memref<4x8x8xf32, #tpu.memory_space<vmem>>, vector<1x2x8xf32>
    %229 = vector.shape_cast %228 : vector<1x2x8xf32> to vector<2x8xf32>
    %230 = vector.shape_cast %227 : vector<2x8xf32> to vector<1x2x8xf32>
    tpu.vector_store %arg22[%c0_268, %c2_269, %c0_270], %230 {strides = array<i32>} : memref<4x8x8xf32, #tpu.memory_space<vmem>>, vector<1x2x8xf32>,
    %c2_271 = arith.constant 2 : index
    %c0_272 = arith.constant 0 : index
    %231 = vector.load %arg19[%c2_271, %c0_272] : memref<8x8xf32, #tpu.memory_space<vmem>>, vector<2x8xf32>
    %c1_273 = arith.constant 1 : index
    %c2_274 = arith.constant 2 : index
    %c0_275 = arith.constant 0 : index
    %232 = vector.load %arg22[%c1_273, %c2_274, %c0_275] : memref<4x8x8xf32, #tpu.memory_space<vmem>>, vector<1x2x8xf32>
    %233 = vector.shape_cast %232 : vector<1x2x8xf32> to vector<2x8xf32>
    %234 = vector.shape_cast %231 : vector<2x8xf32> to vector<1x2x8xf32>
    tpu.vector_store %arg22[%c1_273, %c2_274, %c0_275], %234 {strides = array<i32>} : memref<4x8x8xf32, #tpu.memory_space<vmem>>, vector<1x2x8xf32>,
    %c4_276 = arith.constant 4 : index
    %c0_277 = arith.constant 0 : index
    %235 = vector.load %arg19[%c4_276, %c0_277] : memref<8x8xf32, #tpu.memory_space<vmem>>, vector<2x8xf32>
    %c2_278 = arith.constant 2 : index
    %c2_279 = arith.constant 2 : index
    %c0_280 = arith.constant 0 : index
    %236 = vector.load %arg22[%c2_278, %c2_279, %c0_280] : memref<4x8x8xf32, #tpu.memory_space<vmem>>, vector<1x2x8xf32>
    %237 = vector.shape_cast %236 : vector<1x2x8xf32> to vector<2x8xf32>
    %238 = vector.shape_cast %235 : vector<2x8xf32> to vector<1x2x8xf32>
    tpu.vector_store %arg22[%c2_278, %c2_279, %c0_280], %238 {strides = array<i32>} : memref<4x8x8xf32, #tpu.memory_space<vmem>>, vector<1x2x8xf32>,
    %c6_281 = arith.constant 6 : index
    %c0_282 = arith.constant 0 : index
    %239 = vector.load %arg19[%c6_281, %c0_282] : memref<8x8xf32, #tpu.memory_space<vmem>>, vector<2x8xf32>
    %c3_283 = arith.constant 3 : index
    %c2_284 = arith.constant 2 : index
    %c0_285 = arith.constant 0 : index
    %240 = vector.load %arg22[%c3_283, %c2_284, %c0_285] : memref<4x8x8xf32, #tpu.memory_space<vmem>>, vector<1x2x8xf32>
    %241 = vector.shape_cast %240 : vector<1x2x8xf32> to vector<2x8xf32>
    %242 = vector.shape_cast %239 : vector<2x8xf32> to vector<1x2x8xf32>
    tpu.vector_store %arg22[%c3_283, %c2_284, %c0_285], %242 {strides = array<i32>} : memref<4x8x8xf32, #tpu.memory_space<vmem>>, vector<1x2x8xf32>,
    %c2_286 = arith.constant 2 : index
    %c0_287 = arith.constant 0 : index
    %c0_288 = arith.constant 0 : index
    %243 = vector.load %arg6[%c2_286, %c0_287, %c0_288] : memref<4x32x8xbf16, #tpu.memory_space<vmem>>, vector<1x32x8xbf16>
    %244 = vector.shape_cast %243 : vector<1x32x8xbf16> to vector<32x8xbf16>
    %cst_289 = arith.constant dense<0.000000e+00> : vector<8x8xf32>
    %245 = tpu.matmul %2, %244, %cst_289 {dimension_numbers = #tpu.dot_dimension_numbers<[1], [0], [0], [1], [0, 0, 1, 1], [], []>} : vector<8x32xbf16>, vector<32x8xbf16>, vector<8x8xf32> -> vector<8x8xf32>
    %c2_290 = arith.constant 2 : index
    %c0_291 = arith.constant 0 : index
    %c0_292 = arith.constant 0 : index
    %246 = vector.load %arg7[%c2_290, %c0_291, %c0_292] : memref<4x1x8xf32, #tpu.memory_space<vmem>>, vector<1x1x8xf32>
    %247 = vector.shape_cast %246 : vector<1x1x8xf32> to vector<1x8xf32>
    %248 = vector.broadcast %247 : vector<1x8xf32> to vector<8x8xf32>
    %249 = arith.addf %245, %248 : vector<8x8xf32>
    %c0_293 = arith.constant 0 : index
    %c0_294 = arith.constant 0 : index
    %250 = vector.load %arg19[%c0_293, %c0_294] : memref<8x8xf32, #tpu.memory_space<vmem>>, vector<8x8xf32>
    tpu.vector_store %arg19[%c0_293, %c0_294], %249 {strides = array<i32>} : memref<8x8xf32, #tpu.memory_space<vmem>>, vector<8x8xf32>,
    %c0_295 = arith.constant 0 : index
    %c0_296 = arith.constant 0 : index
    %251 = vector.load %arg19[%c0_295, %c0_296] : memref<8x8xf32, #tpu.memory_space<vmem>>, vector<2x8xf32>
    %c0_297 = arith.constant 0 : index
    %c4_298 = arith.constant 4 : index
    %c0_299 = arith.constant 0 : index
    %252 = vector.load %arg22[%c0_297, %c4_298, %c0_299] : memref<4x8x8xf32, #tpu.memory_space<vmem>>, vector<1x2x8xf32>
    %253 = vector.shape_cast %252 : vector<1x2x8xf32> to vector<2x8xf32>
    %254 = vector.shape_cast %251 : vector<2x8xf32> to vector<1x2x8xf32>
    tpu.vector_store %arg22[%c0_297, %c4_298, %c0_299], %254 {strides = array<i32>} : memref<4x8x8xf32, #tpu.memory_space<vmem>>, vector<1x2x8xf32>,
    %c2_300 = arith.constant 2 : index
    %c0_301 = arith.constant 0 : index
    %255 = vector.load %arg19[%c2_300, %c0_301] : memref<8x8xf32, #tpu.memory_space<vmem>>, vector<2x8xf32>
    %c1_302 = arith.constant 1 : index
    %c4_303 = arith.constant 4 : index
    %c0_304 = arith.constant 0 : index
    %256 = vector.load %arg22[%c1_302, %c4_303, %c0_304] : memref<4x8x8xf32, #tpu.memory_space<vmem>>, vector<1x2x8xf32>
    %257 = vector.shape_cast %256 : vector<1x2x8xf32> to vector<2x8xf32>
    %258 = vector.shape_cast %255 : vector<2x8xf32> to vector<1x2x8xf32>
    tpu.vector_store %arg22[%c1_302, %c4_303, %c0_304], %258 {strides = array<i32>} : memref<4x8x8xf32, #tpu.memory_space<vmem>>, vector<1x2x8xf32>,
    %c4_305 = arith.constant 4 : index
    %c0_306 = arith.constant 0 : index
    %259 = vector.load %arg19[%c4_305, %c0_306] : memref<8x8xf32, #tpu.memory_space<vmem>>, vector<2x8xf32>
    %c2_307 = arith.constant 2 : index
    %c4_308 = arith.constant 4 : index
    %c0_309 = arith.constant 0 : index
    %260 = vector.load %arg22[%c2_307, %c4_308, %c0_309] : memref<4x8x8xf32, #tpu.memory_space<vmem>>, vector<1x2x8xf32>
    %261 = vector.shape_cast %260 : vector<1x2x8xf32> to vector<2x8xf32>
    %262 = vector.shape_cast %259 : vector<2x8xf32> to vector<1x2x8xf32>
    tpu.vector_store %arg22[%c2_307, %c4_308, %c0_309], %262 {strides = array<i32>} : memref<4x8x8xf32, #tpu.memory_space<vmem>>, vector<1x2x8xf32>,
    %c6_310 = arith.constant 6 : index
    %c0_311 = arith.constant 0 : index
    %263 = vector.load %arg19[%c6_310, %c0_311] : memref<8x8xf32, #tpu.memory_space<vmem>>, vector<2x8xf32>
    %c3_312 = arith.constant 3 : index
    %c4_313 = arith.constant 4 : index
    %c0_314 = arith.constant 0 : index
    %264 = vector.load %arg22[%c3_312, %c4_313, %c0_314] : memref<4x8x8xf32, #tpu.memory_space<vmem>>, vector<1x2x8xf32>
    %265 = vector.shape_cast %264 : vector<1x2x8xf32> to vector<2x8xf32>
    %266 = vector.shape_cast %263 : vector<2x8xf32> to vector<1x2x8xf32>
    tpu.vector_store %arg22[%c3_312, %c4_313, %c0_314], %266 {strides = array<i32>} : memref<4x8x8xf32, #tpu.memory_space<vmem>>, vector<1x2x8xf32>,
    %c3_315 = arith.constant 3 : index
    %c0_316 = arith.constant 0 : index
    %c0_317 = arith.constant 0 : index
    %267 = vector.load %arg6[%c3_315, %c0_316, %c0_317] : memref<4x32x8xbf16, #tpu.memory_space<vmem>>, vector<1x32x8xbf16>
    %268 = vector.shape_cast %267 : vector<1x32x8xbf16> to vector<32x8xbf16>
    %cst_318 = arith.constant dense<0.000000e+00> : vector<8x8xf32>
    %269 = tpu.matmul %2, %268, %cst_318 {dimension_numbers = #tpu.dot_dimension_numbers<[1], [0], [0], [1], [0, 0, 1, 1], [], []>} : vector<8x32xbf16>, vector<32x8xbf16>, vector<8x8xf32> -> vector<8x8xf32>
    %c3_319 = arith.constant 3 : index
    %c0_320 = arith.constant 0 : index
    %c0_321 = arith.constant 0 : index
    %270 = vector.load %arg7[%c3_319, %c0_320, %c0_321] : memref<4x1x8xf32, #tpu.memory_space<vmem>>, vector<1x1x8xf32>
    %271 = vector.shape_cast %270 : vector<1x1x8xf32> to vector<1x8xf32>
    %272 = vector.broadcast %271 : vector<1x8xf32> to vector<8x8xf32>
    %273 = arith.addf %269, %272 : vector<8x8xf32>
    %c0_322 = arith.constant 0 : index
    %c0_323 = arith.constant 0 : index
    %274 = vector.load %arg19[%c0_322, %c0_323] : memref<8x8xf32, #tpu.memory_space<vmem>>, vector<8x8xf32>
    tpu.vector_store %arg19[%c0_322, %c0_323], %273 {strides = array<i32>} : memref<8x8xf32, #tpu.memory_space<vmem>>, vector<8x8xf32>,
    %c0_324 = arith.constant 0 : index
    %c0_325 = arith.constant 0 : index
    %275 = vector.load %arg19[%c0_324, %c0_325] : memref<8x8xf32, #tpu.memory_space<vmem>>, vector<2x8xf32>
    %c0_326 = arith.constant 0 : index
    %c6_327 = arith.constant 6 : index
    %c0_328 = arith.constant 0 : index
    %276 = vector.load %arg22[%c0_326, %c6_327, %c0_328] : memref<4x8x8xf32, #tpu.memory_space<vmem>>, vector<1x2x8xf32>
    %277 = vector.shape_cast %276 : vector<1x2x8xf32> to vector<2x8xf32>
    %278 = vector.shape_cast %275 : vector<2x8xf32> to vector<1x2x8xf32>
    tpu.vector_store %arg22[%c0_326, %c6_327, %c0_328], %278 {strides = array<i32>} : memref<4x8x8xf32, #tpu.memory_space<vmem>>, vector<1x2x8xf32>,
    %c2_329 = arith.constant 2 : index
    %c0_330 = arith.constant 0 : index
    %279 = vector.load %arg19[%c2_329, %c0_330] : memref<8x8xf32, #tpu.memory_space<vmem>>, vector<2x8xf32>
    %c1_331 = arith.constant 1 : index
    %c6_332 = arith.constant 6 : index
    %c0_333 = arith.constant 0 : index
    %280 = vector.load %arg22[%c1_331, %c6_332, %c0_333] : memref<4x8x8xf32, #tpu.memory_space<vmem>>, vector<1x2x8xf32>
    %281 = vector.shape_cast %280 : vector<1x2x8xf32> to vector<2x8xf32>
    %282 = vector.shape_cast %279 : vector<2x8xf32> to vector<1x2x8xf32>
    tpu.vector_store %arg22[%c1_331, %c6_332, %c0_333], %282 {strides = array<i32>} : memref<4x8x8xf32, #tpu.memory_space<vmem>>, vector<1x2x8xf32>,
    %c4_334 = arith.constant 4 : index
    %c0_335 = arith.constant 0 : index
    %283 = vector.load %arg19[%c4_334, %c0_335] : memref<8x8xf32, #tpu.memory_space<vmem>>, vector<2x8xf32>
    %c2_336 = arith.constant 2 : index
    %c6_337 = arith.constant 6 : index
    %c0_338 = arith.constant 0 : index
    %284 = vector.load %arg22[%c2_336, %c6_337, %c0_338] : memref<4x8x8xf32, #tpu.memory_space<vmem>>, vector<1x2x8xf32>
    %285 = vector.shape_cast %284 : vector<1x2x8xf32> to vector<2x8xf32>
    %286 = vector.shape_cast %283 : vector<2x8xf32> to vector<1x2x8xf32>
    tpu.vector_store %arg22[%c2_336, %c6_337, %c0_338], %286 {strides = array<i32>} : memref<4x8x8xf32, #tpu.memory_space<vmem>>, vector<1x2x8xf32>,
    %c6_339 = arith.constant 6 : index
    %c0_340 = arith.constant 0 : index
    %287 = vector.load %arg19[%c6_339, %c0_340] : memref<8x8xf32, #tpu.memory_space<vmem>>, vector<2x8xf32>
    %c3_341 = arith.constant 3 : index
    %c6_342 = arith.constant 6 : index
    %c0_343 = arith.constant 0 : index
    %288 = vector.load %arg22[%c3_341, %c6_342, %c0_343] : memref<4x8x8xf32, #tpu.memory_space<vmem>>, vector<1x2x8xf32>
    %289 = vector.shape_cast %288 : vector<1x2x8xf32> to vector<2x8xf32>
    %290 = vector.shape_cast %287 : vector<2x8xf32> to vector<1x2x8xf32>
    tpu.vector_store %arg22[%c3_341, %c6_342, %c0_343], %290 {strides = array<i32>} : memref<4x8x8xf32, #tpu.memory_space<vmem>>, vector<1x2x8xf32>,
    %c0_344 = arith.constant 0 : index
    %c0_345 = arith.constant 0 : index
    %c0_346 = arith.constant 0 : index
    %291 = vector.load %arg20[%c0_344, %c0_345, %c0_346] : memref<4x8x8xf32, #tpu.memory_space<vmem>>, vector<4x8x8xf32>
    %292 = arith.truncf %291 : vector<4x8x8xf32> to vector<4x8x8xbf16>
    %c0_347 = arith.constant 0 : index
    %c0_348 = arith.constant 0 : index
    %c0_349 = arith.constant 0 : index
    %293 = vector.load %arg21[%c0_347, %c0_348, %c0_349] : memref<4x8x8xf32, #tpu.memory_space<vmem>>, vector<4x8x8xf32>
    %294 = arith.truncf %293 : vector<4x8x8xf32> to vector<4x8x8xbf16>
    %c0_350 = arith.constant 0 : index
    %c0_351 = arith.constant 0 : index
    %c0_352 = arith.constant 0 : index
    %295 = vector.load %arg22[%c0_350, %c0_351, %c0_352] : memref<4x8x8xf32, #tpu.memory_space<vmem>>, vector<4x8x8xf32>
    %296 = arith.truncf %295 : vector<4x8x8xf32> to vector<4x8x8xbf16>
    "tpu.trace_start"() <{level = 10 : i32, message = "hsd,htd->hst"}> : () -> ()
    %cst_353 = arith.constant dense<0.000000e+00> : vector<4x8x8xf32>
    %297 = tpu.matmul %292, %294, %cst_353 {dimension_numbers = #tpu.dot_dimension_numbers<[2], [2], [1], [1], [0, 0, 0, 1, 1, 1], [0], [0]>} : vector<4x8x8xbf16>, vector<4x8x8xbf16>, vector<4x8x8xf32> -> vector<4x8x8xf32>
    "tpu.trace_stop"() : () -> ()
    %cst_354 = arith.constant 0.353553385 : f32
    %298 = vector.broadcast %cst_354 : f32 to vector<4x8x8xf32>
    %299 = arith.mulf %297, %298 : vector<4x8x8xf32>
    %cst_355 = arith.constant dense<0xFF800000> : vector<4x8xf32>
    %300 = vector.multi_reduction <maximumf>, %299, %cst_355 [2] : vector<4x8x8xf32> to vector<4x8xf32>
    %301 = vector.shape_cast %300 : vector<4x8xf32> to vector<4x8x1xf32>
    %302 = vector.broadcast %301 : vector<4x8x1xf32> to vector<4x8x8xf32>
    %303 = arith.subf %299, %302 : vector<4x8x8xf32>
    %304 = math.exp %303 : vector<4x8x8xf32>
    %cst_356 = arith.constant dense<0.000000e+00> : vector<4x8xf32>
    %305 = vector.multi_reduction <add>, %304, %cst_356 [2] : vector<4x8x8xf32> to vector<4x8xf32>
    %306 = vector.shape_cast %305 : vector<4x8xf32> to vector<4x8x1xf32>
    %307 = tpu.reciprocal %306 {approx = true} : vector<4x8x1xf32> -> vector<4x8x1xf32>
    %308 = vector.broadcast %307 : vector<4x8x1xf32> to vector<4x8x8xf32>
    %309 = arith.mulf %304, %308 : vector<4x8x8xf32>
    %310 = arith.truncf %309 : vector<4x8x8xf32> to vector<4x8x8xbf16>
    "tpu.trace_start"() <{level = 10 : i32, message = "hst,htd->hsd"}> : () -> ()
    %cst_357 = arith.constant dense<0.000000e+00> : vector<4x8x8xf32>
    %311 = tpu.matmul %310, %296, %cst_357 {dimension_numbers = #tpu.dot_dimension_numbers<[2], [1], [1], [2], [0, 0, 0, 1, 1, 2], [0], [0]>} : vector<4x8x8xbf16>, vector<4x8x8xbf16>, vector<4x8x8xf32> -> vector<4x8x8xf32>
    "tpu.trace_stop"() : () -> ()
    %c0_358 = arith.constant 0 : index
    %c0_359 = arith.constant 0 : index
    %c0_360 = arith.constant 0 : index
    %312 = vector.load %arg23[%c0_358, %c0_359, %c0_360] : memref<4x8x8xf32, #tpu.memory_space<vmem>>, vector<4x8x8xf32>
    tpu.vector_store %arg23[%c0_358, %c0_359, %c0_360], %311 {strides = array<i32>} : memref<4x8x8xf32, #tpu.memory_space<vmem>>, vector<4x8x8xf32>,
    %c0_361 = arith.constant 0 : index
    %c0_362 = arith.constant 0 : index
    %313 = vector.load %arg9[%c0_361, %c0_362] : memref<1x32xf32, #tpu.memory_space<vmem>>, vector<1x32xf32>
    %314 = vector.broadcast %313 : vector<1x32xf32> to vector<8x32xf32>
    %315 = arith.addf %1, %314 : vector<8x32xf32>
    %c0_363 = arith.constant 0 : index
    %c0_364 = arith.constant 0 : index
    %c0_365 = arith.constant 0 : index
    %316 = vector.load %arg23[%c0_363, %c0_364, %c0_365] : memref<4x8x8xf32, #tpu.memory_space<vmem>>, vector<1x2x8xf32>
    %317 = vector.shape_cast %316 : vector<1x2x8xf32> to vector<2x8xf32>
    %c0_366 = arith.constant 0 : index
    %c0_367 = arith.constant 0 : index
    %318 = vector.load %arg19[%c0_366, %c0_367] : memref<8x8xf32, #tpu.memory_space<vmem>>, vector<2x8xf32>
    tpu.vector_store %arg19[%c0_366, %c0_367], %317 {strides = array<i32>} : memref<8x8xf32, #tpu.memory_space<vmem>>, vector<2x8xf32>,
    %c1_368 = arith.constant 1 : index
    %c0_369 = arith.constant 0 : index
    %c0_370 = arith.constant 0 : index
    %319 = vector.load %arg23[%c1_368, %c0_369, %c0_370] : memref<4x8x8xf32, #tpu.memory_space<vmem>>, vector<1x2x8xf32>
    %320 = vector.shape_cast %319 : vector<1x2x8xf32> to vector<2x8xf32>
    %c2_371 = arith.constant 2 : index
    %c0_372 = arith.constant 0 : index
    %321 = vector.load %arg19[%c2_371, %c0_372] : memref<8x8xf32, #tpu.memory_space<vmem>>, vector<2x8xf32>
    tpu.vector_store %arg19[%c2_371, %c0_372], %320 {strides = array<i32>} : memref<8x8xf32, #tpu.memory_space<vmem>>, vector<2x8xf32>,
    %c2_373 = arith.constant 2 : index
    %c0_374 = arith.constant 0 : index
    %c0_375 = arith.constant 0 : index
    %322 = vector.load %arg23[%c2_373, %c0_374, %c0_375] : memref<4x8x8xf32, #tpu.memory_space<vmem>>, vector<1x2x8xf32>
    %323 = vector.shape_cast %322 : vector<1x2x8xf32> to vector<2x8xf32>
    %c4_376 = arith.constant 4 : index
    %c0_377 = arith.constant 0 : index
    %324 = vector.load %arg19[%c4_376, %c0_377] : memref<8x8xf32, #tpu.memory_space<vmem>>, vector<2x8xf32>
    tpu.vector_store %arg19[%c4_376, %c0_377], %323 {strides = array<i32>} : memref<8x8xf32, #tpu.memory_space<vmem>>, vector<2x8xf32>,
    %c3_378 = arith.constant 3 : index
    %c0_379 = arith.constant 0 : index
    %c0_380 = arith.constant 0 : index
    %325 = vector.load %arg23[%c3_378, %c0_379, %c0_380] : memref<4x8x8xf32, #tpu.memory_space<vmem>>, vector<1x2x8xf32>
    %326 = vector.shape_cast %325 : vector<1x2x8xf32> to vector<2x8xf32>
    %c6_381 = arith.constant 6 : index
    %c0_382 = arith.constant 0 : index
    %327 = vector.load %arg19[%c6_381, %c0_382] : memref<8x8xf32, #tpu.memory_space<vmem>>, vector<2x8xf32>
    tpu.vector_store %arg19[%c6_381, %c0_382], %326 {strides = array<i32>} : memref<8x8xf32, #tpu.memory_space<vmem>>, vector<2x8xf32>,
    %c0_383 = arith.constant 0 : index
    %c0_384 = arith.constant 0 : index
    %328 = vector.load %arg19[%c0_383, %c0_384] : memref<8x8xf32, #tpu.memory_space<vmem>>, vector<8x8xf32>
    %329 = arith.truncf %328 : vector<8x8xf32> to vector<8x8xbf16>
    %c0_385 = arith.constant 0 : index
    %c0_386 = arith.constant 0 : index
    %c0_387 = arith.constant 0 : index
    %330 = vector.load %arg8[%c0_385, %c0_386, %c0_387] : memref<4x8x32xbf16, #tpu.memory_space<vmem>>, vector<1x8x32xbf16>
    %331 = vector.shape_cast %330 : vector<1x8x32xbf16> to vector<8x32xbf16>
    %cst_388 = arith.constant dense<0.000000e+00> : vector<8x32xf32>
    %332 = tpu.matmul %329, %331, %cst_388 {dimension_numbers = #tpu.dot_dimension_numbers<[1], [0], [0], [1], [0, 0, 1, 1], [], []>} : vector<8x8xbf16>, vector<8x32xbf16>, vector<8x32xf32> -> vector<8x32xf32>
    %333 = arith.addf %315, %332 : vector<8x32xf32>
    %c0_389 = arith.constant 0 : index
    %c2_390 = arith.constant 2 : index
    %c0_391 = arith.constant 0 : index
    %334 = vector.load %arg23[%c0_389, %c2_390, %c0_391] : memref<4x8x8xf32, #tpu.memory_space<vmem>>, vector<1x2x8xf32>
    %335 = vector.shape_cast %334 : vector<1x2x8xf32> to vector<2x8xf32>
    %c0_392 = arith.constant 0 : index
    %c0_393 = arith.constant 0 : index
    %336 = vector.load %arg19[%c0_392, %c0_393] : memref<8x8xf32, #tpu.memory_space<vmem>>, vector<2x8xf32>
    tpu.vector_store %arg19[%c0_392, %c0_393], %335 {strides = array<i32>} : memref<8x8xf32, #tpu.memory_space<vmem>>, vector<2x8xf32>,
    %c1_394 = arith.constant 1 : index
    %c2_395 = arith.constant 2 : index
    %c0_396 = arith.constant 0 : index
    %337 = vector.load %arg23[%c1_394, %c2_395, %c0_396] : memref<4x8x8xf32, #tpu.memory_space<vmem>>, vector<1x2x8xf32>
    %338 = vector.shape_cast %337 : vector<1x2x8xf32> to vector<2x8xf32>
    %c2_397 = arith.constant 2 : index
    %c0_398 = arith.constant 0 : index
    %339 = vector.load %arg19[%c2_397, %c0_398] : memref<8x8xf32, #tpu.memory_space<vmem>>, vector<2x8xf32>
    tpu.vector_store %arg19[%c2_397, %c0_398], %338 {strides = array<i32>} : memref<8x8xf32, #tpu.memory_space<vmem>>, vector<2x8xf32>,
    %c2_399 = arith.constant 2 : index
    %c2_400 = arith.constant 2 : index
    %c0_401 = arith.constant 0 : index
    %340 = vector.load %arg23[%c2_399, %c2_400, %c0_401] : memref<4x8x8xf32, #tpu.memory_space<vmem>>, vector<1x2x8xf32>
    %341 = vector.shape_cast %340 : vector<1x2x8xf32> to vector<2x8xf32>
    %c4_402 = arith.constant 4 : index
    %c0_403 = arith.constant 0 : index
    %342 = vector.load %arg19[%c4_402, %c0_403] : memref<8x8xf32, #tpu.memory_space<vmem>>, vector<2x8xf32>
    tpu.vector_store %arg19[%c4_402, %c0_403], %341 {strides = array<i32>} : memref<8x8xf32, #tpu.memory_space<vmem>>, vector<2x8xf32>,
    %c3_404 = arith.constant 3 : index
    %c2_405 = arith.constant 2 : index
    %c0_406 = arith.constant 0 : index
    %343 = vector.load %arg23[%c3_404, %c2_405, %c0_406] : memref<4x8x8xf32, #tpu.memory_space<vmem>>, vector<1x2x8xf32>
    %344 = vector.shape_cast %343 : vector<1x2x8xf32> to vector<2x8xf32>
    %c6_407 = arith.constant 6 : index
    %c0_408 = arith.constant 0 : index
    %345 = vector.load %arg19[%c6_407, %c0_408] : memref<8x8xf32, #tpu.memory_space<vmem>>, vector<2x8xf32>
    tpu.vector_store %arg19[%c6_407, %c0_408], %344 {strides = array<i32>} : memref<8x8xf32, #tpu.memory_space<vmem>>, vector<2x8xf32>,
    %c0_409 = arith.constant 0 : index
    %c0_410 = arith.constant 0 : index
    %346 = vector.load %arg19[%c0_409, %c0_410] : memref<8x8xf32, #tpu.memory_space<vmem>>, vector<8x8xf32>
    %347 = arith.truncf %346 : vector<8x8xf32> to vector<8x8xbf16>
    %c1_411 = arith.constant 1 : index
    %c0_412 = arith.constant 0 : index
    %c0_413 = arith.constant 0 : index
    %348 = vector.load %arg8[%c1_411, %c0_412, %c0_413] : memref<4x8x32xbf16, #tpu.memory_space<vmem>>, vector<1x8x32xbf16>
    %349 = vector.shape_cast %348 : vector<1x8x32xbf16> to vector<8x32xbf16>
    %cst_414 = arith.constant dense<0.000000e+00> : vector<8x32xf32>
    %350 = tpu.matmul %347, %349, %cst_414 {dimension_numbers = #tpu.dot_dimension_numbers<[1], [0], [0], [1], [0, 0, 1, 1], [], []>} : vector<8x8xbf16>, vector<8x32xbf16>, vector<8x32xf32> -> vector<8x32xf32>
    %351 = arith.addf %333, %350 : vector<8x32xf32>
    %c0_415 = arith.constant 0 : index
    %c4_416 = arith.constant 4 : index
    %c0_417 = arith.constant 0 : index
    %352 = vector.load %arg23[%c0_415, %c4_416, %c0_417] : memref<4x8x8xf32, #tpu.memory_space<vmem>>, vector<1x2x8xf32>
    %353 = vector.shape_cast %352 : vector<1x2x8xf32> to vector<2x8xf32>
    %c0_418 = arith.constant 0 : index
    %c0_419 = arith.constant 0 : index
    %354 = vector.load %arg19[%c0_418, %c0_419] : memref<8x8xf32, #tpu.memory_space<vmem>>, vector<2x8xf32>
    tpu.vector_store %arg19[%c0_418, %c0_419], %353 {strides = array<i32>} : memref<8x8xf32, #tpu.memory_space<vmem>>, vector<2x8xf32>,
    %c1_420 = arith.constant 1 : index
    %c4_421 = arith.constant 4 : index
    %c0_422 = arith.constant 0 : index
    %355 = vector.load %arg23[%c1_420, %c4_421, %c0_422] : memref<4x8x8xf32, #tpu.memory_space<vmem>>, vector<1x2x8xf32>
    %356 = vector.shape_cast %355 : vector<1x2x8xf32> to vector<2x8xf32>
    %c2_423 = arith.constant 2 : index
    %c0_424 = arith.constant 0 : index
    %357 = vector.load %arg19[%c2_423, %c0_424] : memref<8x8xf32, #tpu.memory_space<vmem>>, vector<2x8xf32>
    tpu.vector_store %arg19[%c2_423, %c0_424], %356 {strides = array<i32>} : memref<8x8xf32, #tpu.memory_space<vmem>>, vector<2x8xf32>,
    %c2_425 = arith.constant 2 : index
    %c4_426 = arith.constant 4 : index
    %c0_427 = arith.constant 0 : index
    %358 = vector.load %arg23[%c2_425, %c4_426, %c0_427] : memref<4x8x8xf32, #tpu.memory_space<vmem>>, vector<1x2x8xf32>
    %359 = vector.shape_cast %358 : vector<1x2x8xf32> to vector<2x8xf32>
    %c4_428 = arith.constant 4 : index
    %c0_429 = arith.constant 0 : index
    %360 = vector.load %arg19[%c4_428, %c0_429] : memref<8x8xf32, #tpu.memory_space<vmem>>, vector<2x8xf32>
    tpu.vector_store %arg19[%c4_428, %c0_429], %359 {strides = array<i32>} : memref<8x8xf32, #tpu.memory_space<vmem>>, vector<2x8xf32>,
    %c3_430 = arith.constant 3 : index
    %c4_431 = arith.constant 4 : index
    %c0_432 = arith.constant 0 : index
    %361 = vector.load %arg23[%c3_430, %c4_431, %c0_432] : memref<4x8x8xf32, #tpu.memory_space<vmem>>, vector<1x2x8xf32>
    %362 = vector.shape_cast %361 : vector<1x2x8xf32> to vector<2x8xf32>
    %c6_433 = arith.constant 6 : index
    %c0_434 = arith.constant 0 : index
    %363 = vector.load %arg19[%c6_433, %c0_434] : memref<8x8xf32, #tpu.memory_space<vmem>>, vector<2x8xf32>
    tpu.vector_store %arg19[%c6_433, %c0_434], %362 {strides = array<i32>} : memref<8x8xf32, #tpu.memory_space<vmem>>, vector<2x8xf32>,
    %c0_435 = arith.constant 0 : index
    %c0_436 = arith.constant 0 : index
    %364 = vector.load %arg19[%c0_435, %c0_436] : memref<8x8xf32, #tpu.memory_space<vmem>>, vector<8x8xf32>
    %365 = arith.truncf %364 : vector<8x8xf32> to vector<8x8xbf16>
    %c2_437 = arith.constant 2 : index
    %c0_438 = arith.constant 0 : index
    %c0_439 = arith.constant 0 : index
    %366 = vector.load %arg8[%c2_437, %c0_438, %c0_439] : memref<4x8x32xbf16, #tpu.memory_space<vmem>>, vector<1x8x32xbf16>
    %367 = vector.shape_cast %366 : vector<1x8x32xbf16> to vector<8x32xbf16>
    %cst_440 = arith.constant dense<0.000000e+00> : vector<8x32xf32>
    %368 = tpu.matmul %365, %367, %cst_440 {dimension_numbers = #tpu.dot_dimension_numbers<[1], [0], [0], [1], [0, 0, 1, 1], [], []>} : vector<8x8xbf16>, vector<8x32xbf16>, vector<8x32xf32> -> vector<8x32xf32>
    %369 = arith.addf %351, %368 : vector<8x32xf32>
    %c0_441 = arith.constant 0 : index
    %c6_442 = arith.constant 6 : index
    %c0_443 = arith.constant 0 : index
    %370 = vector.load %arg23[%c0_441, %c6_442, %c0_443] : memref<4x8x8xf32, #tpu.memory_space<vmem>>, vector<1x2x8xf32>
    %371 = vector.shape_cast %370 : vector<1x2x8xf32> to vector<2x8xf32>
    %c0_444 = arith.constant 0 : index
    %c0_445 = arith.constant 0 : index
    %372 = vector.load %arg19[%c0_444, %c0_445] : memref<8x8xf32, #tpu.memory_space<vmem>>, vector<2x8xf32>
    tpu.vector_store %arg19[%c0_444, %c0_445], %371 {strides = array<i32>} : memref<8x8xf32, #tpu.memory_space<vmem>>, vector<2x8xf32>,
    %c1_446 = arith.constant 1 : index
    %c6_447 = arith.constant 6 : index
    %c0_448 = arith.constant 0 : index
    %373 = vector.load %arg23[%c1_446, %c6_447, %c0_448] : memref<4x8x8xf32, #tpu.memory_space<vmem>>, vector<1x2x8xf32>
    %374 = vector.shape_cast %373 : vector<1x2x8xf32> to vector<2x8xf32>
    %c2_449 = arith.constant 2 : index
    %c0_450 = arith.constant 0 : index
    %375 = vector.load %arg19[%c2_449, %c0_450] : memref<8x8xf32, #tpu.memory_space<vmem>>, vector<2x8xf32>
    tpu.vector_store %arg19[%c2_449, %c0_450], %374 {strides = array<i32>} : memref<8x8xf32, #tpu.memory_space<vmem>>, vector<2x8xf32>,
    %c2_451 = arith.constant 2 : index
    %c6_452 = arith.constant 6 : index
    %c0_453 = arith.constant 0 : index
    %376 = vector.load %arg23[%c2_451, %c6_452, %c0_453] : memref<4x8x8xf32, #tpu.memory_space<vmem>>, vector<1x2x8xf32>
    %377 = vector.shape_cast %376 : vector<1x2x8xf32> to vector<2x8xf32>
    %c4_454 = arith.constant 4 : index
    %c0_455 = arith.constant 0 : index
    %378 = vector.load %arg19[%c4_454, %c0_455] : memref<8x8xf32, #tpu.memory_space<vmem>>, vector<2x8xf32>
    tpu.vector_store %arg19[%c4_454, %c0_455], %377 {strides = array<i32>} : memref<8x8xf32, #tpu.memory_space<vmem>>, vector<2x8xf32>,
    %c3_456 = arith.constant 3 : index
    %c6_457 = arith.constant 6 : index
    %c0_458 = arith.constant 0 : index
    %379 = vector.load %arg23[%c3_456, %c6_457, %c0_458] : memref<4x8x8xf32, #tpu.memory_space<vmem>>, vector<1x2x8xf32>
    %380 = vector.shape_cast %379 : vector<1x2x8xf32> to vector<2x8xf32>
    %c6_459 = arith.constant 6 : index
    %c0_460 = arith.constant 0 : index
    %381 = vector.load %arg19[%c6_459, %c0_460] : memref<8x8xf32, #tpu.memory_space<vmem>>, vector<2x8xf32>
    tpu.vector_store %arg19[%c6_459, %c0_460], %380 {strides = array<i32>} : memref<8x8xf32, #tpu.memory_space<vmem>>, vector<2x8xf32>,
    %c0_461 = arith.constant 0 : index
    %c0_462 = arith.constant 0 : index
    %382 = vector.load %arg19[%c0_461, %c0_462] : memref<8x8xf32, #tpu.memory_space<vmem>>, vector<8x8xf32>
    %383 = arith.truncf %382 : vector<8x8xf32> to vector<8x8xbf16>
    %c3_463 = arith.constant 3 : index
    %c0_464 = arith.constant 0 : index
    %c0_465 = arith.constant 0 : index
    %384 = vector.load %arg8[%c3_463, %c0_464, %c0_465] : memref<4x8x32xbf16, #tpu.memory_space<vmem>>, vector<1x8x32xbf16>
    %385 = vector.shape_cast %384 : vector<1x8x32xbf16> to vector<8x32xbf16>
    %cst_466 = arith.constant dense<0.000000e+00> : vector<8x32xf32>
    %386 = tpu.matmul %383, %385, %cst_466 {dimension_numbers = #tpu.dot_dimension_numbers<[1], [0], [0], [1], [0, 0, 1, 1], [], []>} : vector<8x8xbf16>, vector<8x32xbf16>, vector<8x32xf32> -> vector<8x32xf32>
    %387 = arith.addf %369, %386 : vector<8x32xf32>
    %cst_467 = arith.constant dense<0.000000e+00> : vector<8xf32>
    %388 = vector.multi_reduction <add>, %387, %cst_467 [1] : vector<8x32xf32> to vector<8xf32>
    %389 = vector.shape_cast %388 : vector<8xf32> to vector<8x1xf32>
    %cst_468 = arith.constant 3.200000e+01 : f32
    %390 = vector.broadcast %cst_468 : f32 to vector<8x1xf32>
    %391 = arith.divf %389, %390 : vector<8x1xf32>
    %392 = vector.broadcast %391 : vector<8x1xf32> to vector<8x32xf32>
    %393 = arith.subf %387, %392 : vector<8x32xf32>
    %394 = arith.mulf %393, %393 : vector<8x32xf32>
    %cst_469 = arith.constant dense<0.000000e+00> : vector<8xf32>
    %395 = vector.multi_reduction <add>, %394, %cst_469 [1] : vector<8x32xf32> to vector<8xf32>
    %396 = vector.shape_cast %395 : vector<8xf32> to vector<8x1xf32>
    %cst_470 = arith.constant 3.200000e+01 : f32
    %397 = vector.broadcast %cst_470 : f32 to vector<8x1xf32>
    %398 = arith.divf %396, %397 : vector<8x1xf32>
    %399 = vector.broadcast %391 : vector<8x1xf32> to vector<8x32xf32>
    %400 = arith.subf %387, %399 : vector<8x32xf32>
    %cst_471 = arith.constant 9.99999974E-6 : f32
    %401 = vector.broadcast %cst_471 : f32 to vector<8x1xf32>
    %402 = arith.addf %398, %401 : vector<8x1xf32>
    %403 = math.rsqrt %402 : vector<8x1xf32>
    %404 = vector.broadcast %403 : vector<8x1xf32> to vector<8x32xf32>
    %405 = arith.mulf %400, %404 : vector<8x32xf32>
    %c0_472 = arith.constant 0 : index
    %c0_473 = arith.constant 0 : index
    %406 = vector.load %arg10[%c0_472, %c0_473] : memref<1x32xf32, #tpu.memory_space<vmem>>, vector<1x32xf32>
    %407 = vector.broadcast %406 : vector<1x32xf32> to vector<8x32xf32>
    %408 = arith.mulf %405, %407 : vector<8x32xf32>
    %c0_474 = arith.constant 0 : index
    %c0_475 = arith.constant 0 : index
    %409 = vector.load %arg11[%c0_474, %c0_475] : memref<1x32xf32, #tpu.memory_space<vmem>>, vector<1x32xf32>
    %410 = vector.broadcast %409 : vector<1x32xf32> to vector<8x32xf32>
    %411 = arith.addf %408, %410 : vector<8x32xf32>
    %412 = arith.truncf %411 : vector<8x32xf32> to vector<8x32xbf16>
    %c0_476 = arith.constant 0 : index
    %c0_477 = arith.constant 0 : index
    %413 = vector.load %arg12[%c0_476, %c0_477] : memref<32x64xbf16, #tpu.memory_space<vmem>>, vector<32x64xbf16>
    %cst_478 = arith.constant dense<0.000000e+00> : vector<8x64xf32>
    %414 = tpu.matmul %412, %413, %cst_478 {dimension_numbers = #tpu.dot_dimension_numbers<[1], [0], [0], [1], [0, 0, 1, 1], [], []>} : vector<8x32xbf16>, vector<32x64xbf16>, vector<8x64xf32> -> vector<8x64xf32>
    %c0_479 = arith.constant 0 : index
    %c0_480 = arith.constant 0 : index
    %415 = vector.load %arg13[%c0_479, %c0_480] : memref<1x64xf32, #tpu.memory_space<vmem>>, vector<1x64xf32>
    %416 = vector.broadcast %415 : vector<1x64xf32> to vector<8x64xf32>
    %417 = arith.addf %414, %416 : vector<8x64xf32>
    %cst_481 = arith.constant 0.000000e+00 : f32
    %418 = vector.broadcast %cst_481 : f32 to vector<8x64xf32>
    %419 = arith.maximumf %417, %418 : vector<8x64xf32>
    %420 = arith.truncf %419 : vector<8x64xf32> to vector<8x64xbf16>
    %c0_482 = arith.constant 0 : index
    %c0_483 = arith.constant 0 : index
    %421 = vector.load %arg14[%c0_482, %c0_483] : memref<64x32xbf16, #tpu.memory_space<vmem>>, vector<64x32xbf16>
    %cst_484 = arith.constant dense<0.000000e+00> : vector<8x32xf32>
    %422 = tpu.matmul %420, %421, %cst_484 {dimension_numbers = #tpu.dot_dimension_numbers<[1], [0], [0], [1], [0, 0, 1, 1], [], []>} : vector<8x64xbf16>, vector<64x32xbf16>, vector<8x32xf32> -> vector<8x32xf32>
    %c0_485 = arith.constant 0 : index
    %c0_486 = arith.constant 0 : index
    %423 = vector.load %arg15[%c0_485, %c0_486] : memref<1x32xf32, #tpu.memory_space<vmem>>, vector<1x32xf32>
    %424 = vector.broadcast %423 : vector<1x32xf32> to vector<8x32xf32>
    %425 = arith.addf %422, %424 : vector<8x32xf32>
    %426 = arith.addf %425, %411 : vector<8x32xf32>
    %cst_487 = arith.constant dense<0.000000e+00> : vector<8xf32>
    %427 = vector.multi_reduction <add>, %426, %cst_487 [1] : vector<8x32xf32> to vector<8xf32>
    %428 = vector.shape_cast %427 : vector<8xf32> to vector<8x1xf32>
    %cst_488 = arith.constant 3.200000e+01 : f32
    %429 = vector.broadcast %cst_488 : f32 to vector<8x1xf32>
    %430 = arith.divf %428, %429 : vector<8x1xf32>
    %431 = vector.broadcast %430 : vector<8x1xf32> to vector<8x32xf32>
    %432 = arith.subf %426, %431 : vector<8x32xf32>
    %433 = arith.mulf %432, %432 : vector<8x32xf32>
    %cst_489 = arith.constant dense<0.000000e+00> : vector<8xf32>
    %434 = vector.multi_reduction <add>, %433, %cst_489 [1] : vector<8x32xf32> to vector<8xf32>
    %435 = vector.shape_cast %434 : vector<8xf32> to vector<8x1xf32>
    %cst_490 = arith.constant 3.200000e+01 : f32
    %436 = vector.broadcast %cst_490 : f32 to vector<8x1xf32>
    %437 = arith.divf %435, %436 : vector<8x1xf32>
    %438 = vector.broadcast %430 : vector<8x1xf32> to vector<8x32xf32>
    %439 = arith.subf %426, %438 : vector<8x32xf32>
    %cst_491 = arith.constant 9.99999974E-6 : f32
    %440 = vector.broadcast %cst_491 : f32 to vector<8x1xf32>
    %441 = arith.addf %437, %440 : vector<8x1xf32>
    %442 = math.rsqrt %441 : vector<8x1xf32>
    %443 = vector.broadcast %442 : vector<8x1xf32> to vector<8x32xf32>
    %444 = arith.mulf %439, %443 : vector<8x32xf32>
    %c0_492 = arith.constant 0 : index
    %c0_493 = arith.constant 0 : index
    %445 = vector.load %arg16[%c0_492, %c0_493] : memref<1x32xf32, #tpu.memory_space<vmem>>, vector<1x32xf32>
    %446 = vector.broadcast %445 : vector<1x32xf32> to vector<8x32xf32>
    %447 = arith.mulf %444, %446 : vector<8x32xf32>
    %c0_494 = arith.constant 0 : index
    %c0_495 = arith.constant 0 : index
    %448 = vector.load %arg17[%c0_494, %c0_495] : memref<1x32xf32, #tpu.memory_space<vmem>>, vector<1x32xf32>
    %449 = vector.broadcast %448 : vector<1x32xf32> to vector<8x32xf32>
    %450 = arith.addf %447, %449 : vector<8x32xf32>
    %c0_496 = arith.constant 0 : index
    %c0_497 = arith.constant 0 : index
    %c0_498 = arith.constant 0 : index
    %451 = vector.load %arg18[%c0_496, %c0_497, %c0_498] : memref<1x8x32xf32, #tpu.memory_space<vmem>>, vector<1x8x32xf32>
    %452 = vector.shape_cast %451 : vector<1x8x32xf32> to vector<8x32xf32>
    %453 = vector.shape_cast %450 : vector<8x32xf32> to vector<1x8x32xf32>
    tpu.vector_store %arg18[%c0_496, %c0_497, %c0_498], %453 {strides = array<i32>} : memref<1x8x32xf32, #tpu.memory_space<vmem>>, vector<1x8x32xf32>,
    return
  }
  func.func @transform_0(%arg0: i32) -> (i32, i32, i32) {
    %c0_i32 = arith.constant 0 : i32
    %c0_i32_0 = arith.constant 0 : i32
    %c0_i32_1 = arith.constant 0 : i32
    return %arg0, %c0_i32, %c0_i32_0 : i32, i32, i32
  }
  func.func @transform_1(%arg0: i32) -> (i32, i32, i32) {
    %c0_i32 = arith.constant 0 : i32
    %c0_i32_0 = arith.constant 0 : i32
    %c0_i32_1 = arith.constant 0 : i32
    %c0_i32_2 = arith.constant 0 : i32
    return %c0_i32, %c0_i32_0, %c0_i32_1 : i32, i32, i32
  }
  func.func @transform_2(%arg0: i32) -> (i32, i32, i32) {
    %c0_i32 = arith.constant 0 : i32
    %c0_i32_0 = arith.constant 0 : i32
    %c0_i32_1 = arith.constant 0 : i32
    %c0_i32_2 = arith.constant 0 : i32
    return %c0_i32, %c0_i32_0, %c0_i32_1 : i32, i32, i32
  }
  func.func @transform_3(%arg0: i32) -> (i32, i32, i32) {
    %c0_i32 = arith.constant 0 : i32
    %c0_i32_0 = arith.constant 0 : i32
    %c0_i32_1 = arith.constant 0 : i32
    %c0_i32_2 = arith.constant 0 : i32
    return %c0_i32, %c0_i32_0, %c0_i32_1 : i32, i32, i32
  }
  func.func @transform_4(%arg0: i32) -> (i32, i32, i32) {
    %c0_i32 = arith.constant 0 : i32
    %c0_i32_0 = arith.constant 0 : i32
    %c0_i32_1 = arith.constant 0 : i32
    %c0_i32_2 = arith.constant 0 : i32
    return %c0_i32, %c0_i32_0, %c0_i32_1 : i32, i32, i32
  }
  func.func @transform_5(%arg0: i32) -> (i32, i32, i32) {
    %c0_i32 = arith.constant 0 : i32
    %c0_i32_0 = arith.constant 0 : i32
    %c0_i32_1 = arith.constant 0 : i32
    %c0_i32_2 = arith.constant 0 : i32
    return %c0_i32, %c0_i32_0, %c0_i32_1 : i32, i32, i32
  }
  func.func @transform_6(%arg0: i32) -> (i32, i32, i32) {
    %c0_i32 = arith.constant 0 : i32
    %c0_i32_0 = arith.constant 0 : i32
    %c0_i32_1 = arith.constant 0 : i32
    %c0_i32_2 = arith.constant 0 : i32
    return %c0_i32, %c0_i32_0, %c0_i32_1 : i32, i32, i32
  }
  func.func @transform_7(%arg0: i32) -> (i32, i32, i32) {
    %c0_i32 = arith.constant 0 : i32
    %c0_i32_0 = arith.constant 0 : i32
    %c0_i32_1 = arith.constant 0 : i32
    %c0_i32_2 = arith.constant 0 : i32
    return %c0_i32, %c0_i32_0, %c0_i32_1 : i32, i32, i32
  }
  func.func @transform_8(%arg0: i32) -> (i32, i32) {
    %c0_i32 = arith.constant 0 : i32
    %c0_i32_0 = arith.constant 0 : i32
    %c0_i32_1 = arith.constant 0 : i32
    return %c0_i32, %c0_i32_0 : i32, i32
  }
  func.func @transform_9(%arg0: i32) -> (i32, i32) {
    %c0_i32 = arith.constant 0 : i32
    %c0_i32_0 = arith.constant 0 : i32
    %c0_i32_1 = arith.constant 0 : i32
    return %c0_i32, %c0_i32_0 : i32, i32
  }
  func.func @transform_10(%arg0: i32) -> (i32, i32) {
    %c0_i32 = arith.constant 0 : i32
    %c0_i32_0 = arith.constant 0 : i32
    %c0_i32_1 = arith.constant 0 : i32
    return %c0_i32, %c0_i32_0 : i32, i32
  }
  func.func @transform_11(%arg0: i32) -> (i32, i32) {
    %c0_i32 = arith.constant 0 : i32
    %c0_i32_0 = arith.constant 0 : i32
    %c0_i32_1 = arith.constant 0 : i32
    return %c0_i32, %c0_i32_0 : i32, i32
  }
  func.func @transform_12(%arg0: i32) -> (i32, i32) {
    %c0_i32 = arith.constant 0 : i32
    %c0_i32_0 = arith.constant 0 : i32
    %c0_i32_1 = arith.constant 0 : i32
    return %c0_i32, %c0_i32_0 : i32, i32
  }
  func.func @transform_13(%arg0: i32) -> (i32, i32) {
    %c0_i32 = arith.constant 0 : i32
    %c0_i32_0 = arith.constant 0 : i32
    %c0_i32_1 = arith.constant 0 : i32
    return %c0_i32, %c0_i32_0 : i32, i32
  }
  func.func @transform_14(%arg0: i32) -> (i32, i32) {
    %c0_i32 = arith.constant 0 : i32
    %c0_i32_0 = arith.constant 0 : i32
    %c0_i32_1 = arith.constant 0 : i32
    return %c0_i32, %c0_i32_0 : i32, i32
  }
  func.func @transform_15(%arg0: i32) -> (i32, i32) {
    %c0_i32 = arith.constant 0 : i32
    %c0_i32_0 = arith.constant 0 : i32
    %c0_i32_1 = arith.constant 0 : i32
    return %c0_i32, %c0_i32_0 : i32, i32
  }
  func.func @transform_16(%arg0: i32) -> (i32, i32) {
    %c0_i32 = arith.constant 0 : i32
    %c0_i32_0 = arith.constant 0 : i32
    %c0_i32_1 = arith.constant 0 : i32
    return %c0_i32, %c0_i32_0 : i32, i32
  }
  func.func @transform_17(%arg0: i32) -> (i32, i32, i32) {
    %c0_i32 = arith.constant 0 : i32
    %c0_i32_0 = arith.constant 0 : i32
    %c0_i32_1 = arith.constant 0 : i32
    return %arg0, %c0_i32, %c0_i32_0 : i32, i32, i32
  }
}

</mosaic_0001>

<bundles_post_ra>
// kernel: encoder_forward.1
= control target key start
LH: loop header
LB: loop body
LE: loop exit
PB: predicated region body
PF: predicated region fallthrough
CT: control target
= control target key end

     0   :  { %s3577_s0 = inlined_call_operand.vmem [shape: f32[2,8,32], index: 0, kind: input, shape index: {}]   ;;  %s3578_s1 = inlined_call_operand.vmem [shape: bf16[4,32,8], index: 1, kind: input, shape index: {}]   ;;  %s3579_s2 = inlined_call_operand.vmem [shape: f32[4,1,8], index: 2, kind: input, shape index: {}]   ;;  %s3580_s3 = inlined_call_operand.vmem [shape: bf16[4,32,8], index: 3, kind: input, shape index: {}]   ;;  %s3581_s4 = inlined_call_operand.vmem [shape: f32[4,1,8], index: 4, kind: input, shape index: {}]   ;;  %s3582_s5 = inlined_call_operand.vmem [shape: bf16[4,32,8], index: 5, kind: input, shape index: {}]   ;;  %s3583_s6 = inlined_call_operand.vmem [shape: f32[4,1,8], index: 6, kind: input, shape index: {}]   ;;  %s3584_s7 = inlined_call_operand.vmem [shape: bf16[4,8,32], index: 7, kind: input, shape index: {}]   ;;  %s3585_s8 = inlined_call_operand.vmem [shape: f32[1,32], index: 8, kind: input, shape index: {}]   ;;  %s3586_s9 = inlined_call_operand.vmem [shape: f32[1,32], index: 9, kind: input, shape index: {}]   ;;  %s3587_s10 = inlined_call_operand.vmem [shape: f32[1,32], index: 10, kind: input, shape index: {}]   ;;  %s3588_s11 = inlined_call_operand.vmem [shape: bf16[32,64], index: 11, kind: input, shape index: {}]   ;;  %s3589_s12 = inlined_call_operand.vmem [shape: f32[1,64], index: 12, kind: input, shape index: {}]   ;;  %s3590_s13 = inlined_call_operand.vmem [shape: bf16[64,32], index: 13, kind: input, shape index: {}]   ;;  %s3591_s14 = inlined_call_operand.vmem [shape: f32[1,32], index: 14, kind: input, shape index: {}]   ;;  %s3592_s15 = inlined_call_operand.vmem [shape: f32[1,32], index: 15, kind: input, shape index: {}]   ;;  %s3593_s16 = inlined_call_operand.vmem [shape: f32[1,32], index: 16, kind: input, shape index: {}]   ;;  %s3594_s17 = inlined_call_operand.hbm [shape: f32[2,8,32], index: 17, kind: output, shape index: {}]  }
   0x1   :  { %3601 = sst [smem:[#allocation15_spill]] %s3577_s0 }
   0x2   :  { %3602 = sst [smem:[#allocation16_spill]] %s3578_s1 }
   0x3   :  { %3603 = sst [smem:[#allocation17_spill]] %s3579_s2 }
   0x4   :  { %3604 = sst [smem:[#allocation18_spill]] %s3580_s3 }
   0x5   :  { %22 = vsyncpa [#allocation8], 0 }
   0x6   :  { %24 = vsyncpa [#allocation8 + $0x1], 0  ;;  %s3076_s24 = smov 0   ;;  %s3078_s25 = smov 0  }
   0x7   :  { %s3080_s26 = smov 0   ;;  %s3082_s27 = smov 0  }
   0x8 LB: > { %3605 = sst [smem:[#allocation10_spill]] %s2969_s24  ;;  %s3097_s28 = sadd.s32 4294967295, %s2981_s27   ;;  %s2981_s27 = sphi %s3082_s27, %s3618_s27   ;;  %s2977_s26 = sphi %s3080_s26, %s3620_s26   ;;  %s2973_s25 = sphi %s3078_s25, %s3622_s25   ;;  %s2969_s24 = sphi %s3076_s24, %s3621_s24  }
   0x9   : > { %3606 = sst [smem:[#allocation11_spill]] %s2977_s26  ;;  %s2425_s29 = sadd.s32 4294967294, %s2981_s27  }
   0xa   : > { %s3101_s0 = sadd.s32 1, %s2981_s27   ;;  %s399_s30 = sadd.s32 1, %s2977_s26 }
   0xb   : > { %3607 = sst [smem:[#allocation12_spill]] %s3101_s0  ;;  %s396_s18 = ssub.s32 %s2981_s27, %s3101_s0 }
   0xc   : > { %p409_p0 = scmp.ne.s32.totalorder %s2977_s26, %s2973_s25  ;;  %p397_p1 = scmp.eq.s32.totalorder %s396_s18, 0 }
   0xd   : > { %p410_p2 = scmp.eq.s32.totalorder %s3097_s28, 1  ;;  %p415_p3 = scmp.ne.s32.totalorder %s2973_s25, %s2969_s24 }
   0xe   : > { %p416_p4 = scmp.eq.s32.totalorder %s2425_s29, 1  ;;  %p2428_p7 = scmp.ge.s32.totalorder %s2981_s27, 1 }
   0xf   : > { %s3112_s19 = scalar_select %p397_p1, %s2977_s26, %s399_s30  }
  0x10   : > { %p3114_p5 = por %p410_p2, %p409_p0  ;;  %p3118_p6 = por %p416_p4, %p415_p3 }
  0x11   : > { %3608 = sst [smem:[#allocation13_spill]] %s3112_s19  ;;  %p489_p8 = scmp.lt.s32.totalorder %s2981_s27, 3 }
  0x12   : > { %s3610_s20 = scalar_select %p3118_p6, 1, 0 }
  0x13   : > { %p490_p9 = pnand %p2428_p7, %p489_p8 }
  0x14   : > { %3611 = sst [smem:[#allocation14_spill]] %s3610_s20  ;;  %s3612_s23 = sld [smem:[#allocation16_spill]] (!%p490_p9)  ;;  %v2983_v1 = vmov (!%p490_p9), 0.0   ;;  %vm2984_vm0 = vmmov (!%p490_p9), 0   ;;  %vm570_vm1 = vcmask (!%p490_p9), 261120   ;;  %v2884_v19 = vld [vmem:[%s3582_s5] sm:$0xff] (!%p490_p9)  }
  0x15   : > { %493 = sbr.rel (%p490_p9) target bundleno = 2444 (0x98c), region = 88  ;;  %2626 = vmatprep.subr.bf16.mxu0 (!%p490_p9), %v2983_v1  ;;  %2634 = vmatprep.subr.bf16.mxu1 (!%p490_p9), %v2983_v1  ;;  %p540_p10 = scmp.lt.s32.totalorder (!%p490_p9), %s3097_s28, 1  ;;  %v2885_v20 = vld [vmem:[%s3582_s5 + $0x8] sm:$0xff] (!%p490_p9)   ;;  %v2886_v21 = vld [vmem:[%s3582_s5 + $0x10] sm:$0xff] (!%p490_p9)   ;;  %v2887_v22 = vld [vmem:[%s3582_s5 + $0x18] sm:$0xff] (!%p490_p9)   ;;  %vm614_vm2 = vcmask (!%p490_p9), 64512  }
  0x16   : > { %2630 = vmatprep.mubr.msk.bf16.mxu0 (!%p490_p9), %vm2984_vm0, %v2983_v1  ;;  %2638 = vmatprep.mubr.msk.bf16.mxu1 (!%p490_p9), %vm2984_vm0, %v2983_v1  ;;  %s3613_s26 = sld [smem:[#allocation15_spill]] (!%p490_p9)  ;;  %s3614_s3 = sld [smem:[#allocation18_spill]] (!%p490_p9)  ;;  %v2888_v23 = vld [vmem:[%s3582_s5 + $0x20] sm:$0xff] (!%p490_p9)   ;;  %v2890_v24 = vld [vmem:[%s3582_s5 + $0x30] sm:$0xff] (!%p490_p9)   ;;  %v2889_v25 = vld [vmem:[%s3582_s5 + $0x28] sm:$0xff] (!%p490_p9)   ;;  %vm617_vm3 = vcmask (!%p490_p9), 58368  }
  0x17   : > { %v2891_v26 = vld [vmem:[%s3582_s5 + $0x38] sm:$0xff] (!%p490_p9)   ;;  %s3615_s2 = sld [smem:[#allocation17_spill]] (!%p490_p9)  ;;  %vm1707_vm4 = vcmask (!%p490_p9), 1043456   ;;  %vm2277_vm5 = vcmask (!%p490_p9), 523264   ;;  %s2555_s29 = sshll.u32 (!%p490_p9), %s3097_s28, 7 }
  0x1a   : > { %v2868_v0 = vld [vmem:[%s3612_s23] sm:$0xff] (!%p490_p9)   ;;  %v2869_v2 = vld [vmem:[%s3612_s23 + $0x8] sm:$0xff] (!%p490_p9)   ;;  %v2870_v3 = vld [vmem:[%s3612_s23 + $0x10] sm:$0xff] (!%p490_p9)  }
  0x1b   : > { %2627 = vmatpush3.bf16.msra.mxu0 (!%p490_p9), %v2868_v0  ;;  %2635 = vmatpush3.bf16.msra.mxu1 (!%p490_p9), %v2870_v3  ;;  %v2871_v4 = vld [vmem:[%s3612_s23 + $0x18] sm:$0xff] (!%p490_p9)   ;;  %v2872_v5 = vld [vmem:[%s3612_s23 + $0x20] sm:$0xff] (!%p490_p9)   ;;  %v2874_v8 = vld [vmem:[%s3612_s23 + $0x30] sm:$0xff] (!%p490_p9)  }
  0x1c   : > { %2628 = vmatprep.subr.bf16.mxu0 %v2983_v1  ;;  %s541_s21 = scalar_select %p540_p10, %s3097_s28, 1  ;;  %2636 = vmatprep.subr.bf16.mxu1 %v2983_v1  ;;  %v2873_v9 = vld [vmem:[%s3612_s23 + $0x28] sm:$0xff]   ;;  %v2875_v10 = vld [vmem:[%s3612_s23 + $0x38] sm:$0xff]   ;;  %v2876_v11 = vld [vmem:[%s3614_s3] sm:$0xff]  }
  0x1d   : > { %v2878_v12 = vld [vmem:[%s3614_s3 + $0x10] sm:$0xff]   ;;  %v2877_v13 = vld [vmem:[%s3614_s3 + $0x8] sm:$0xff]   ;;  %v2879_v14 = vld [vmem:[%s3614_s3 + $0x18] sm:$0xff]   ;;  %s2985_s28 = smov [#allocation7]  }
  0x1e   : > { %s2430_s19 = sshll.u32 %s541_s21, 3  ;;  %v2880_v15 = vld [vmem:[%s3614_s3 + $0x20] sm:$0xff]   ;;  %v2882_v16 = vld [vmem:[%s3614_s3 + $0x30] sm:$0xff]   ;;  %v2881_v17 = vld [vmem:[%s3614_s3 + $0x28] sm:$0xff]   ;;  %s537_s21 = sand.u32 1, %s2973_s25  }
  0x1f   : > { %2629 = vmatpush3.bf16.msra.mxu0 %v2869_v2  ;;  %s3149_s0 = scalar_lea.vmem %s3613_s26, %s2430_s19  ;;  %2637 = vmatpush3.bf16.msra.mxu1 %v2871_v4  ;;  %v2883_v18 = vld [vmem:[%s3614_s3 + $0x38] sm:$0xff]   ;;  %v2431_v27 = vld [vmem:[%s3615_s2] ss:$0 sm:$0xff]  ;;  %v2440_v37 = vld [vmem:[%s3615_s2 + $0x1] ss:$0 sm:$0xff]  ;;  %s2429_s22 = sshll.u32 %s537_s21, 3 }
  0x20   : > { %2642 = vmatprep.subr.bf16.mxu0 %v2983_v1  ;;  %v545_v6 = vld [vmem:[%s3149_s0] sm:$0xff]  ;;  %2650 = vmatprep.subr.bf16.mxu1 %v2983_v1  ;;  %s539_s19 = scalar_lea.vmem [#allocation7], %s2429_s22  ;;  %s3534_s3 = scalar_lea.hbm %s3594_s17, %s2555_s29 }
  0x21   : > { %v3156_v7 = vpack.c.bf16 %v545_v6, %v545_v6  ;;  %v2449_v51 = vld [vmem:[%s3615_s2 + $0x2] ss:$0 sm:$0xff]  ;;  %v2458_v2 = vld [vmem:[%s3615_s2 + $0x3] ss:$0 sm:$0xff]  ;;  %s2366_s30 = sshll.u32 %s539_s19, 4  ;;  %s2923_s22 = sshll.u32 %s2985_s28, 4  ;;  %s3536_s30 = int_to_ptr.vmem [resolvable:$true] %s2366_s30  ;;  %s2924_s22 = int_to_ptr.vmem [resolvable:$false] %s2923_s22 }
  0x22   : > { %s2919_s24 = scalar_lea.vmem %s3536_s30, 128  ;;  %s2925_s26 = scalar_lea.vmem %s2924_s22, 256 }
  0x23   : > { %2631 = vmatmul.mubr.msk.bf16.vlgmr.msra.gmra.mrb[0].mxu0 %vm570_vm1, %v3156_v7  ;;  %2639 = vmatmul.mubr.msk.bf16.vlgmr.msra.gmra.mrb[0].mxu1 %vm570_vm1, %v3156_v7  ;;  %p2920_p11 = scmp.ne.s32.totalorder %s3536_s30, %s2919_s24  ;;  %p2926_p0 = scmp.lt.s32.totalorder %s3536_s30, %s2924_s22 }
  0x24   : > { %2643 = vmatpush3.bf16.msra.mxu0 %v2872_v5  ;;  %2646 = vmatprep.mubr.msk.bf16.mxu0 %vm2984_vm0, %v2983_v1  ;;  %p2927_p1 = scmp.lt.s32.totalorder %s2925_s26, %s2919_s24 }
  0x25   : > { %2644 = vmatprep.subr.bf16.mxu0 %v2983_v1  ;;  %2651 = vmatpush3.bf16.msra.mxu1 %v2874_v8  ;;  %p2921_p12 = pnand %p2920_p11, %p3114_p5 }
  0x26   : > { %2652 = vmatprep.subr.bf16.mxu1 %v2983_v1  ;;  %2654 = vmatprep.mubr.msk.bf16.mxu1 %vm2984_vm0, %v2983_v1  ;;  %p2928_p2 = por %p2927_p1, %p2926_p0 }
  0x27   : > { %p2922_p13 = pneg %p2921_p12 }
  0x28   : > { %2645 = vmatpush3.bf16.msra.mxu0 %v2873_v9 }
  0x29   : > { %2653 = vmatpush3.bf16.msra.mxu1 %v2875_v10  ;;  %2658 = vmatprep.subr.bf16.mxu0 %v2983_v1  ;;  %p2929_p3 = pnand %p2928_p2, %p2922_p13 }
  0x2a   : > { %2666 = vmatprep.subr.bf16.mxu1 %v2983_v1 }
  0x2b   : > { %2647 = vmatmul.mubr.msk.bf16.vlgmr.msra.gmra.mrb[4].mxu0 %vm570_vm1, %v3156_v7 }
  0x2c   : > { %2655 = vmatmul.mubr.msk.bf16.vlgmr.msra.gmra.mrb[4].mxu1 %vm570_vm1, %v3156_v7  ;;  %2659 = vmatpush3.bf16.msra.mxu0 %v2876_v11 }
  0x2d   : > { %2660 = vmatprep.subr.bf16.mxu0 %v2983_v1  ;;  %2662 = vmatprep.mubr.msk.bf16.mxu0 %vm2984_vm0, %v2983_v1 }
  0x2e   : > { %2667 = vmatpush3.bf16.msra.mxu1 %v2878_v12  ;;  %2670 = vmatprep.mubr.msk.bf16.mxu1 %vm2984_vm0, %v2983_v1 }
  0x2f   : > { %2668 = vmatprep.subr.bf16.mxu1 %v2983_v1 }
  0x30   : > { %2661 = vmatpush3.bf16.msra.mxu0 %v2877_v13 }
  0x31   : > { %2674 = vmatprep.subr.bf16.mxu0 %v2983_v1 }
  0x32   : > { %2669 = vmatpush3.bf16.msra.mxu1 %v2879_v14 }
  0x33   : > { %2663 = vmatmul.mubr.msk.bf16.vlgmr.msra.gmra.mrb[8].mxu0 %vm570_vm1, %v3156_v7  ;;  %2682 = vmatprep.subr.bf16.mxu1 %v2983_v1 }
  0x34   : > { %2675 = vmatpush3.bf16.msra.mxu0 %v2880_v15  ;;  %2678 = vmatprep.mubr.msk.bf16.mxu0 %vm2984_vm0, %v2983_v1 }
  0x35   : > { %2671 = vmatmul.mubr.msk.bf16.vlgmr.msra.gmra.mrb[8].mxu1 %vm570_vm1, %v3156_v7  ;;  %2676 = vmatprep.subr.bf16.mxu0 %v2983_v1 }
  0x36   : > { %2683 = vmatpush3.bf16.msra.mxu1 %v2882_v16  ;;  %2686 = vmatprep.mubr.msk.bf16.mxu1 %vm2984_vm0, %v2983_v1  ;;  %v2462_v16 = vld [vmem:[%s3581_s4] ss:$0 sm:$0xff] }
  0x37   : > { %2684 = vmatprep.subr.bf16.mxu1 %v2983_v1 }
  0x38   : > { %2677 = vmatpush3.bf16.msra.mxu0 %v2881_v17 }
  0x39   : > { %2690 = vmatprep.subr.bf16.mxu0 %v2983_v1 }
  0x3a   : > { %2685 = vmatpush3.bf16.msra.mxu1 %v2883_v18 }
  0x3b   : > { %2679 = vmatmul.mubr.msk.bf16.vlgmr.msra.gmra.mrb[12].mxu0 %vm570_vm1, %v3156_v7  ;;  %2698 = vmatprep.subr.bf16.mxu1 %v2983_v1 }
  0x3c   : > { %2694 = vmatprep.mubr.msk.bf16.mxu0 %vm2984_vm0, %v2983_v1  ;;  %2691 = vmatpush3.bf16.msra.mxu0 %v2884_v19 }
  0x3d   : > { %2687 = vmatmul.mubr.msk.bf16.vlgmr.msra.gmra.mrb[12].mxu1 %vm570_vm1, %v3156_v7  ;;  %2692 = vmatprep.subr.bf16.mxu0 %v2983_v1 }
  0x3e   : > { %2702 = vmatprep.mubr.msk.bf16.mxu1 %vm2984_vm0, %v2983_v1  ;;  %2699 = vmatpush3.bf16.msra.mxu1 %v2886_v21 }
  0x3f   : > { %2700 = vmatprep.subr.bf16.mxu1 %v2983_v1 }
  0x40   : > { %2693 = vmatpush3.bf16.msra.mxu0 %v2885_v20 }
  0x41   : > { %2706 = vmatprep.subr.bf16.mxu0 %v2983_v1 }
  0x42   : > { %2701 = vmatpush3.bf16.msra.mxu1 %v2887_v22  ;;  %v2471_v22 = vld [vmem:[%s3581_s4 + $0x1] ss:$0 sm:$0xff] }
  0x43   : > { %2695 = vmatmul.mubr.msk.bf16.vlgmr.msra.gmra.mrb[16].mxu0 %vm570_vm1, %v3156_v7  ;;  %2714 = vmatprep.subr.bf16.mxu1 %v2983_v1 }
  0x44   : > { %2707 = vmatpush3.bf16.msra.mxu0 %v2888_v23  ;;  %2710 = vmatprep.mubr.msk.bf16.mxu0 %vm2984_vm0, %v2983_v1 }
  0x45   : > { %2708 = vmatprep.subr.bf16.mxu0 %v2983_v1  ;;  %2703 = vmatmul.mubr.msk.bf16.vlgmr.msra.gmra.mrb[16].mxu1 %vm570_vm1, %v3156_v7 }
  0x46   : > { %2715 = vmatpush3.bf16.msra.mxu1 %v2890_v24  ;;  %2718 = vmatprep.mubr.msk.bf16.mxu1 %vm2984_vm0, %v2983_v1 }
  0x47   : > { %2716 = vmatprep.subr.bf16.mxu1 %v2983_v1 }
  0x48   : > { %2709 = vmatpush3.bf16.msra.mxu0 %v2889_v25 }
  0x49   : > { %2722 = vmatprep.subr.bf16.mxu0 %v2983_v1 }
  0x4a   : > { %2717 = vmatpush3.bf16.msra.mxu1 %v2891_v26 }
  0x4b   : > { %2711 = vmatmul.mubr.msk.bf16.vlgmr.msra.gmra.mrb[20].mxu0 %vm570_vm1, %v3156_v7  ;;  %2728 = vmatprep.subr.bf16.mxu1 %v2983_v1 }
  0x4c   : > { %2724 = vmatprep.mubr.msk.bf16.mxu0 %vm2984_vm0, %v2983_v1 }
  0x4d   : > { %2719 = vmatmul.mubr.msk.bf16.vlgmr.msra.gmra.mrb[20].mxu1 %vm570_vm1, %v3156_v7 }
  0x4e   : > { %2730 = vmatprep.mubr.msk.bf16.mxu1 %vm2984_vm0, %v2983_v1 }
  0xf6   : > { %v608_v28 = vpop.f32.mrb[0].mxu0  ;;  %v687_v29 = vpop.f32.mrb[0].mxu1 }
  0xf7   : > { %v609_v30 = vadd.f32 %v2431_v27, %v608_v28  ;;  %v2632_v31 = vpop.f32.mrb[1].mxu0  ;;  %v2640_v32 = vpop.f32.mrb[1].mxu1  ;;  %v688_v38 = vadd.f32 %v2440_v37, %v687_v29  ;;  %v2480_v28 = vld [vmem:[%s3581_s4 + $0x2] ss:$0 sm:$0xff] }
  0xf8   : > { %v611_v33 = vpop.f32.mrb[2].mxu0  ;;  %v690_v34 = vpop.f32.mrb[2].mxu1 }
  0xf9   : > { %615 = vst.msk [vmem:[#allocation2] sm:$0xff] %vm614_vm2, %v609_v30  ;;  %v2633_v35 = vpop.f32.mrb[3].mxu0  ;;  %v2641_v36 = vpop.f32.mrb[3].mxu1  ;;  %v2489_v34 = vld [vmem:[%s3581_s4 + $0x3] ss:$0 sm:$0xff] }
  0xfe   : > { %v761_v39 = vpop.f32.mrb[4].mxu0 }
  0xff   : > { %v2648_v40 = vpop.f32.mrb[5].mxu0  ;;  %v835_v41 = vpop.f32.mrb[4].mxu1  ;;  %v762_v53 = vadd.f32 %v2449_v51, %v761_v39 }
 0x100   : > { %v616_v42 = vld [vmem:[#allocation2] sm:$0x3]  ;;  %v619_v43 = vld [vmem:[#allocation2 + $0x2] sm:$0x3]  ;;  %v622_v44 = vld [vmem:[#allocation2 + $0x4] sm:$0x3]  ;;  %v836_v5 = vadd.f32 %v2458_v2, %v835_v41 }
 0x101   : > { %618 = vst.msk [vmem:[#allocation3] sm:$0x3] %vm617_vm3, %v616_v42  ;;  %v625_v45 = vld [vmem:[#allocation2 + $0x6] sm:$0x3]  ;;  %621 = vst.msk [vmem:[#allocation3 + $0x8] sm:$0x3] %vm617_vm3, %v619_v43 }
 0x102   : > { %624 = vst.msk [vmem:[#allocation3 + $0x10] sm:$0x3] %vm617_vm3, %v622_v44  ;;  %v764_v46 = vpop.f32.mrb[6].mxu0  ;;  %v2656_v47 = vpop.f32.mrb[5].mxu1  ;;  %627 = vst.msk [vmem:[#allocation3 + $0x18] sm:$0x3] %vm617_vm3, %v625_v45 }
 0x103   : > { %693 = vst.msk [vmem:[#allocation2] sm:$0xff] %vm614_vm2, %v688_v38  ;;  %v2649_v48 = vpop.f32.mrb[7].mxu0  ;;  %v838_v49 = vpop.f32.mrb[6].mxu1 }
 0x104   : > { %v2657_v50 = vpop.f32.mrb[7].mxu1 }
 0x106   : > { %v907_v52 = vpop.f32.mrb[8].mxu0 }
 0x107   : > { %v2664_v54 = vpop.f32.mrb[9].mxu0  ;;  %v908_v17 = vadd.f32 %v2462_v16, %v907_v52 }
 0x108   : > { %v910_v55 = vpop.f32.mrb[10].mxu0  ;;  %v984_v56 = vpop.f32.mrb[8].mxu1 }
 0x109   : > { %v2665_v61 = vpop.f32.mrb[11].mxu0  ;;  %v2672_v62 = vpop.f32.mrb[9].mxu1  ;;  %v985_v23 = vadd.f32 %v2471_v22, %v984_v56 }
 0x10a   : > { %v694_v57 = vld [vmem:[#allocation2] sm:$0x3]  ;;  %v696_v58 = vld [vmem:[#allocation2 + $0x2] sm:$0x3]  ;;  %v698_v59 = vld [vmem:[#allocation2 + $0x4] sm:$0x3] }
 0x10b   : > { %v700_v60 = vld [vmem:[#allocation2 + $0x6] sm:$0x3]  ;;  %695 = vst.msk [vmem:[#allocation3 + $0x2] sm:$0x3] %vm617_vm3, %v694_v57  ;;  %697 = vst.msk [vmem:[#allocation3 + $0xa] sm:$0x3] %vm617_vm3, %v696_v58 }
 0x10c   : > { %699 = vst.msk [vmem:[#allocation3 + $0x12] sm:$0x3] %vm617_vm3, %v698_v59  ;;  %701 = vst.msk [vmem:[#allocation3 + $0x1a] sm:$0x3] %vm617_vm3, %v700_v60  ;;  %v987_v63 = vpop.f32.mrb[10].mxu1 }
 0x10d   : > { %767 = vst.msk [vmem:[#allocation2] sm:$0xff] %vm614_vm2, %v762_v53  ;;  %v2673_v0 = vpop.f32.mrb[11].mxu1 }
 0x10e   : > { %v1058_v3 = vpop.f32.mrb[12].mxu0  ;;  %v2493_v0 = vld [vmem:[%s3583_s6] ss:$0 sm:$0xff] }
 0x10f   : > { %v2680_v4 = vpop.f32.mrb[13].mxu0  ;;  %v1059_v29 = vadd.f32 %v2480_v28, %v1058_v3 }
 0x110   : > { %v1061_v6 = vpop.f32.mrb[14].mxu0  ;;  %v1132_v7 = vpop.f32.mrb[12].mxu1 }
 0x111   : > { %v2681_v8 = vpop.f32.mrb[15].mxu0  ;;  %v2688_v9 = vpop.f32.mrb[13].mxu1  ;;  %v1133_v35 = vadd.f32 %v2489_v34, %v1132_v7 }
 0x112   : > { %v1135_v14 = vpop.f32.mrb[14].mxu1 }
 0x113   : > { %v2689_v15 = vpop.f32.mrb[15].mxu1 }
 0x114   : > { %v768_v10 = vld [vmem:[#allocation2] sm:$0x3]  ;;  %v770_v11 = vld [vmem:[#allocation2 + $0x2] sm:$0x3]  ;;  %v772_v12 = vld [vmem:[#allocation2 + $0x4] sm:$0x3] }
 0x115   : > { %v774_v13 = vld [vmem:[#allocation2 + $0x6] sm:$0x3]  ;;  %769 = vst.msk [vmem:[#allocation3 + $0x4] sm:$0x3] %vm617_vm3, %v768_v10  ;;  %771 = vst.msk [vmem:[#allocation3 + $0xc] sm:$0x3] %vm617_vm3, %v770_v11 }
 0x116   : > { %773 = vst.msk [vmem:[#allocation3 + $0x14] sm:$0x3] %vm617_vm3, %v772_v12  ;;  %775 = vst.msk [vmem:[#allocation3 + $0x1c] sm:$0x3] %vm617_vm3, %v774_v13  ;;  %v1204_v2 = vpop.f32.mrb[16].mxu0 }
 0x117   : > { %841 = vst.msk [vmem:[#allocation2] sm:$0xff] %vm614_vm2, %v836_v5  ;;  %v1205_v3 = vadd.f32 %v2493_v0, %v1204_v2  ;;  %v2696_v4 = vpop.f32.mrb[17].mxu0  ;;  %v2502_v12 = vld [vmem:[%s3583_s6 + $0x1] ss:$0 sm:$0xff] }
 0x118   : > { %v1207_v5 = vpop.f32.mrb[18].mxu0  ;;  %v1281_v6 = vpop.f32.mrb[16].mxu1 }
 0x119   : > { %v2697_v7 = vpop.f32.mrb[19].mxu0  ;;  %v2704_v8 = vpop.f32.mrb[17].mxu1 }
 0x11a   : > { %v1284_v9 = vpop.f32.mrb[18].mxu1 }
 0x11b   : > { %v2705_v10 = vpop.f32.mrb[19].mxu1 }
 0x11e   : > { %v842_v18 = vld [vmem:[#allocation2] sm:$0x3]  ;;  %v844_v19 = vld [vmem:[#allocation2 + $0x2] sm:$0x3]  ;;  %v846_v20 = vld [vmem:[#allocation2 + $0x4] sm:$0x3] }
 0x11f   : > { %v848_v21 = vld [vmem:[#allocation2 + $0x6] sm:$0x3]  ;;  %843 = vst.msk [vmem:[#allocation3 + $0x6] sm:$0x3] %vm617_vm3, %v842_v18  ;;  %845 = vst.msk [vmem:[#allocation3 + $0xe] sm:$0x3] %vm617_vm3, %v844_v19 }
 0x120   : > { %847 = vst.msk [vmem:[#allocation3 + $0x16] sm:$0x3] %vm617_vm3, %v846_v20  ;;  %849 = vst.msk [vmem:[#allocation3 + $0x1e] sm:$0x3] %vm617_vm3, %v848_v21  ;;  %v1355_v11 = vpop.f32.mrb[20].mxu0  ;;  %v1429_v15 = vpop.f32.mrb[20].mxu1 }
 0x121   : > { %913 = vst.msk [vmem:[#allocation2] sm:$0xff] %vm614_vm2, %v908_v17  ;;  %v2712_v13 = vpop.f32.mrb[21].mxu0  ;;  %v1282_v17 = vadd.f32 %v2502_v12, %v1281_v6  ;;  %v2720_v18 = vpop.f32.mrb[21].mxu1 }
 0x122   : > { %v1358_v14 = vpop.f32.mrb[22].mxu0  ;;  %v1432_v19 = vpop.f32.mrb[22].mxu1 }
 0x123   : > { %v2713_v16 = vpop.f32.mrb[23].mxu0  ;;  %v2721_v20 = vpop.f32.mrb[23].mxu1 }
 0x126   : > { %v1444_v52 = vld [vmem:[#allocation3] sm:$0xff]  ;;  %v1445_v53 = vld [vmem:[#allocation3 + $0x8] sm:$0xff] }
 0x127   : > { %v1448_v56 = vpack.c.bf16 %v1444_v52, %v1444_v52  ;;  %v1449_v57 = vpack.c.bf16 %v1445_v53, %v1445_v53  ;;  %v1446_v60 = vld [vmem:[#allocation3 + $0x10] sm:$0xff]  ;;  %v1447_v61 = vld [vmem:[#allocation3 + $0x18] sm:$0xff] }
 0x128   : > { %v914_v24 = vld [vmem:[#allocation2] sm:$0x3]  ;;  %v916_v25 = vld [vmem:[#allocation2 + $0x2] sm:$0x3]  ;;  %v919_v26 = vld [vmem:[#allocation2 + $0x4] sm:$0x3]  ;;  %v1450_v62 = vpack.c.bf16 %v1446_v60, %v1446_v60  ;;  %v1451_v63 = vpack.c.bf16 %v1447_v61, %v1447_v61 }
 0x129   : > { %915 = vst.msk [vmem:[#allocation4] sm:$0x3] %vm617_vm3, %v914_v24  ;;  %v922_v27 = vld [vmem:[#allocation2 + $0x6] sm:$0x3]  ;;  %918 = vst.msk [vmem:[#allocation4 + $0x8] sm:$0x3] %vm617_vm3, %v916_v25 }
 0x12a   : > { %921 = vst.msk [vmem:[#allocation4 + $0x10] sm:$0x3] %vm617_vm3, %v919_v26  ;;  %924 = vst.msk [vmem:[#allocation4 + $0x18] sm:$0x3] %vm617_vm3, %v922_v27  ;;  %v2511_v25 = vld [vmem:[%s3583_s6 + $0x2] ss:$0 sm:$0xff] }
 0x12b   : > { %990 = vst.msk [vmem:[#allocation2] sm:$0xff] %vm614_vm2, %v985_v23  ;;  %v1356_v26 = vadd.f32 %v2511_v25, %v1355_v11 }
 0x132   : > { %v991_v30 = vld [vmem:[#allocation2] sm:$0x3]  ;;  %v993_v31 = vld [vmem:[#allocation2 + $0x2] sm:$0x3]  ;;  %v995_v32 = vld [vmem:[#allocation2 + $0x4] sm:$0x3] }
 0x133   : > { %992 = vst.msk [vmem:[#allocation4 + $0x2] sm:$0x3] %vm617_vm3, %v991_v30  ;;  %v997_v33 = vld [vmem:[#allocation2 + $0x6] sm:$0x3]  ;;  %994 = vst.msk [vmem:[#allocation4 + $0xa] sm:$0x3] %vm617_vm3, %v993_v31 }
 0x134   : > { %996 = vst.msk [vmem:[#allocation4 + $0x12] sm:$0x3] %vm617_vm3, %v995_v32  ;;  %998 = vst.msk [vmem:[#allocation4 + $0x1a] sm:$0x3] %vm617_vm3, %v997_v33  ;;  %v2520_v31 = vld [vmem:[%s3583_s6 + $0x3] ss:$0 sm:$0xff] }
 0x135   : > { %1064 = vst.msk [vmem:[#allocation2] sm:$0xff] %vm614_vm2, %v1059_v29  ;;  %v1430_v32 = vadd.f32 %v2520_v31, %v1429_v15 }
 0x13c   : > { %v1065_v36 = vld [vmem:[#allocation2] sm:$0x3]  ;;  %v1067_v37 = vld [vmem:[#allocation2 + $0x2] sm:$0x3]  ;;  %v1069_v38 = vld [vmem:[#allocation2 + $0x4] sm:$0x3] }
 0x13d   : > { %1066 = vst.msk [vmem:[#allocation4 + $0x4] sm:$0x3] %vm617_vm3, %v1065_v36  ;;  %v1071_v39 = vld [vmem:[#allocation2 + $0x6] sm:$0x3]  ;;  %1068 = vst.msk [vmem:[#allocation4 + $0xc] sm:$0x3] %vm617_vm3, %v1067_v37 }
 0x13e   : > { %1070 = vst.msk [vmem:[#allocation4 + $0x14] sm:$0x3] %vm617_vm3, %v1069_v38  ;;  %1072 = vst.msk [vmem:[#allocation4 + $0x1c] sm:$0x3] %vm617_vm3, %v1071_v39 }
 0x13f   : > { %1138 = vst.msk [vmem:[#allocation2] sm:$0xff] %vm614_vm2, %v1133_v35 }
 0x146   : > { %v1139_v40 = vld [vmem:[#allocation2] sm:$0x3]  ;;  %v1141_v41 = vld [vmem:[#allocation2 + $0x2] sm:$0x3]  ;;  %v1143_v42 = vld [vmem:[#allocation2 + $0x4] sm:$0x3] }
 0x147   : > { %1140 = vst.msk [vmem:[#allocation4 + $0x6] sm:$0x3] %vm617_vm3, %v1139_v40  ;;  %1142 = vst.msk [vmem:[#allocation4 + $0xe] sm:$0x3] %vm617_vm3, %v1141_v41  ;;  %v1145_v43 = vld [vmem:[#allocation2 + $0x6] sm:$0x3] }
 0x148   : > { %1144 = vst.msk [vmem:[#allocation4 + $0x16] sm:$0x3] %vm617_vm3, %v1143_v42  ;;  %1146 = vst.msk [vmem:[#allocation4 + $0x1e] sm:$0x3] %vm617_vm3, %v1145_v43 }
 0x149   : > { %1210 = vst.msk [vmem:[#allocation2] sm:$0xff] %vm614_vm2, %v1205_v3 }
 0x14e   : > { %v1452_v44 = vld [vmem:[#allocation4] sm:$0xff]  ;;  %v1453_v45 = vld [vmem:[#allocation4 + $0x8] sm:$0xff] }
 0x14f   : > { %v1456_v46 = vpack.c.bf16 %v1452_v44, %v1452_v44  ;;  %v1457_v47 = vpack.c.bf16 %v1453_v45, %v1453_v45  ;;  %v1454_v50 = vld [vmem:[#allocation4 + $0x10] sm:$0xff]  ;;  %v1455_v51 = vld [vmem:[#allocation4 + $0x18] sm:$0xff] }
 0x150   : > { %v1458_v54 = vpack.c.bf16 %v1454_v50, %v1454_v50  ;;  %v1459_v55 = vpack.c.bf16 %v1455_v51, %v1455_v51  ;;  %v1211_v21 = vld [vmem:[#allocation2] sm:$0x3]  ;;  %v1213_v22 = vld [vmem:[#allocation2 + $0x2] sm:$0x3]  ;;  %v1216_v23 = vld [vmem:[#allocation2 + $0x4] sm:$0x3] }
 0x151   : > { %v1472_v48 = vsel %vm614_vm2, %v1456_v46, 0  ;;  %v1518_v49 = vsel %vm614_vm2, %v1457_v47, 0  ;;  %1212 = vst.msk [vmem:[#allocation5] sm:$0x3] %vm617_vm3, %v1211_v21  ;;  %v1219_v24 = vld [vmem:[#allocation2 + $0x6] sm:$0x3] }
 0x152   : > { %2723 = vmatpush3.bf16.xpose.msra.mxu0 %v1472_v48  ;;  %2729 = vmatpush3.bf16.xpose.msra.mxu1 %v1518_v49  ;;  %v1564_v58 = vsel %vm614_vm2, %v1458_v54, 0  ;;  %v1610_v59 = vsel %vm614_vm2, %v1459_v55, 0  ;;  %1215 = vst.msk [vmem:[#allocation5 + $0x8] sm:$0x3] %vm617_vm3, %v1213_v22  ;;  %1218 = vst.msk [vmem:[#allocation5 + $0x10] sm:$0x3] %vm617_vm3, %v1216_v23 }
 0x153   : > { %2734 = vmatprep.subr.bf16.mxu0 %v2983_v1  ;;  %2740 = vmatprep.subr.bf16.mxu1 %v2983_v1  ;;  %1287 = vst.msk [vmem:[#allocation2] sm:$0xff] %vm614_vm2, %v1282_v17 }
 0x154   : > { %1221 = vst.msk [vmem:[#allocation5 + $0x18] sm:$0x3] %vm617_vm3, %v1219_v24 }
 0x159   : > { %2725 = vmatmul.mubr.msk.bf16.vlgmr.msra.gmra.mrb[24].mxu0 %vm614_vm2, %v1448_v56  ;;  %2731 = vmatmul.mubr.msk.bf16.vlgmr.msra.gmra.mrb[24].mxu1 %vm614_vm2, %v1449_v57 }
 0x15a   : > { %2735 = vmatpush3.bf16.xpose.msra.mxu0 %v1564_v58  ;;  %2741 = vmatpush3.bf16.xpose.msra.mxu1 %v1610_v59  ;;  %v1288_v27 = vld [vmem:[#allocation2] sm:$0x3]  ;;  %v1290_v28 = vld [vmem:[#allocation2 + $0x2] sm:$0x3]  ;;  %v1292_v29 = vld [vmem:[#allocation2 + $0x4] sm:$0x3] }
 0x15b   : > { %2736 = vmatprep.mubr.msk.bf16.mxu0 %vm2984_vm0, %v2983_v1  ;;  %2742 = vmatprep.mubr.msk.bf16.mxu1 %vm2984_vm0, %v2983_v1  ;;  %1289 = vst.msk [vmem:[#allocation5 + $0x2] sm:$0x3] %vm617_vm3, %v1288_v27  ;;  %v1294_v30 = vld [vmem:[#allocation2 + $0x6] sm:$0x3]  ;;  %1291 = vst.msk [vmem:[#allocation5 + $0xa] sm:$0x3] %vm617_vm3, %v1290_v28 }
 0x15c   : > { %2746 = vmatprep.subr.bf16.mxu0 %v2983_v1  ;;  %2752 = vmatprep.subr.bf16.mxu1 %v2983_v1  ;;  %1293 = vst.msk [vmem:[#allocation5 + $0x12] sm:$0x3] %vm617_vm3, %v1292_v29  ;;  %1295 = vst.msk [vmem:[#allocation5 + $0x1a] sm:$0x3] %vm617_vm3, %v1294_v30 }
 0x15d   : > { %1361 = vst.msk [vmem:[#allocation2] sm:$0xff] %vm614_vm2, %v1356_v26 }
 0x161   : > { %2737 = vmatmul.mubr.msk.bf16.vlgmr.msra.gmra.mrb[28].mxu0 %vm614_vm2, %v1450_v62  ;;  %2743 = vmatmul.mubr.msk.bf16.vlgmr.msra.gmra.mrb[28].mxu1 %vm614_vm2, %v1451_v63 }
 0x162   : > { %2748 = vmatprep.mubr.msk.bf16.mxu0 %vm2984_vm0, %v2983_v1  ;;  %2754 = vmatprep.mubr.msk.bf16.mxu1 %vm2984_vm0, %v2983_v1 }
 0x164   : > { %v1362_v33 = vld [vmem:[#allocation2] sm:$0x3]  ;;  %v1364_v34 = vld [vmem:[#allocation2 + $0x2] sm:$0x3]  ;;  %v1366_v35 = vld [vmem:[#allocation2 + $0x4] sm:$0x3] }
 0x165   : > { %1363 = vst.msk [vmem:[#allocation5 + $0x4] sm:$0x3] %vm617_vm3, %v1362_v33  ;;  %v1368_v36 = vld [vmem:[#allocation2 + $0x6] sm:$0x3]  ;;  %1365 = vst.msk [vmem:[#allocation5 + $0xc] sm:$0x3] %vm617_vm3, %v1364_v34 }
 0x166   : > { %1367 = vst.msk [vmem:[#allocation5 + $0x14] sm:$0x3] %vm617_vm3, %v1366_v35  ;;  %1369 = vst.msk [vmem:[#allocation5 + $0x1c] sm:$0x3] %vm617_vm3, %v1368_v36 }
 0x167   : > { %1435 = vst.msk [vmem:[#allocation2] sm:$0xff] %vm614_vm2, %v1430_v32 }
 0x16e   : > { %v1436_v37 = vld [vmem:[#allocation2] sm:$0x3]  ;;  %v1438_v38 = vld [vmem:[#allocation2 + $0x2] sm:$0x3]  ;;  %v1440_v39 = vld [vmem:[#allocation2 + $0x4] sm:$0x3] }
 0x16f   : > { %1437 = vst.msk [vmem:[#allocation5 + $0x6] sm:$0x3] %vm617_vm3, %v1436_v37  ;;  %1439 = vst.msk [vmem:[#allocation5 + $0xe] sm:$0x3] %vm617_vm3, %v1438_v38  ;;  %v1442_v40 = vld [vmem:[#allocation2 + $0x6] sm:$0x3] }
 0x170   : > { %1441 = vst.msk [vmem:[#allocation5 + $0x16] sm:$0x3] %vm617_vm3, %v1440_v39  ;;  %1443 = vst.msk [vmem:[#allocation5 + $0x1e] sm:$0x3] %vm617_vm3, %v1442_v40 }
 0x176   : > { %v1460_v41 = vld [vmem:[#allocation5] sm:$0xff]  ;;  %v1461_v42 = vld [vmem:[#allocation5 + $0x8] sm:$0xff] }
 0x177   : > { %v1464_v43 = vpack.c.bf16 %v1460_v41, %v1460_v41  ;;  %v1465_v44 = vpack.c.bf16 %v1461_v42, %v1461_v42  ;;  %v1462_v31 = vld [vmem:[#allocation5 + $0x10] sm:$0xff]  ;;  %v1463_v36 = vld [vmem:[#allocation5 + $0x18] sm:$0xff] }
 0x178   : > { %v1466_v35 = vpack.c.bf16 %v1462_v31, %v1462_v31  ;;  %v1467_v41 = vpack.c.bf16 %v1463_v36, %v1463_v36  ;;  %v2918_v36 = vld [vmem:[%s3149_s0] sm:$0xff]  ;;  %s2353_s0 = scalar_lea.sflag [#allocation8], %s537_s21 }
 0x179   : > { %v1709_v45 = vsel %vm1707_vm4, %v1464_v43, 0  ;;  %v1755_v46 = vsel %vm1707_vm4, %v1465_v44, 0 }
 0x17a   : > { %2747 = vmatpush3.bf16.msra.mxu0 %v1709_v45  ;;  %2753 = vmatpush3.bf16.msra.mxu1 %v1755_v46  ;;  %v1801_v40 = vsel %vm1707_vm4, %v1466_v35, 0  ;;  %v1847_v45 = vsel %vm1707_vm4, %v1467_v41, 0  ;;  %v2532_v35 = vld [vmem:[%s3585_s8] ss:$0 sm:$0xff] }
 0x17b   : > { %2758 = vmatprep.subr.bf16.mxu0 %v2983_v1  ;;  %2764 = vmatprep.subr.bf16.mxu1 %v2983_v1 }
 0x22c   : > { %v1508_v47 = vpop.f32.mrb[24].mxu0  ;;  %v1554_v48 = vpop.f32.mrb[24].mxu1 }
 0x22d   : > { %v1652_v49 = vmul.f32 0.35355338, %v1508_v47  ;;  %v2726_v50 = vpop.f32.mrb[25].mxu0  ;;  %v2732_v51 = vpop.f32.mrb[25].mxu1  ;;  %v1653_v54 = vmul.f32 0.35355338, %v1554_v48 }
 0x22e   : > { %v1511_v52 = vpop.f32.mrb[26].mxu0  ;;  %v1557_v53 = vpop.f32.mrb[26].mxu1  ;;  %v1914_v50 = vld [vmem:[%s3584_s7] sm:$0xf] }
 0x22f   : > { %v2727_v55 = vpop.f32.mrb[27].mxu0  ;;  %v2733_v56 = vpop.f32.mrb[27].mxu1  ;;  %v1656_v57 = vsel %vm614_vm2, %v1652_v49, -inf  ;;  %v1659_v58 = vsel %vm614_vm2, %v1653_v54, -inf  ;;  %v1919_v51 = vsel %vm1707_vm4, %v1914_v50, 0  ;;  %v2893_v50 = vld [vmem:[%s3588_s11 + $0x8] sm:$0xff]  }
 0x230   : > { %1657 = vmax.xlane.f32.xlu0 %v1656_v57 }
 0x234   : > { %v1646_v59 = vpop.f32.mrb[28].mxu1  ;;  %1660 = vmax.xlane.f32.xlu0 %v1659_v58  ;;  %v1600_v60 = vpop.f32.mrb[28].mxu0 }
 0x235   : > { %v1654_v61 = vmul.f32 0.35355338, %v1600_v60  ;;  %v2738_v62 = vpop.f32.mrb[29].mxu0  ;;  %v2744_v63 = vpop.f32.mrb[29].mxu1  ;;  %v1655_v3 = vmul.f32 0.35355338, %v1646_v59 }
 0x236   : > { %v1603_v0 = vpop.f32.mrb[30].mxu0  ;;  %v1649_v2 = vpop.f32.mrb[30].mxu1 }
 0x237   : > { %v2739_v4 = vpop.f32.mrb[31].mxu0  ;;  %v2745_v5 = vpop.f32.mrb[31].mxu1  ;;  %v1662_v6 = vsel %vm614_vm2, %v1654_v61, -inf  ;;  %v1665_v7 = vsel %vm614_vm2, %v1655_v3, -inf }
 0x238   : > { %1663 = vmax.xlane.f32.xlu1 %v1662_v6 }
 0x23c   : > { %1666 = vmax.xlane.f32.xlu1 %v1665_v7 }
 0x2bd   : > { %v1658_v8 = vpop.xlane.xlu0 %1657 }
 0x2be   : > { %v1668_v9 = vsub.f32 %v1652_v49, %v1658_v8 }
 0x2c0   : > { %v1672_v10 = vmul.f32 1.442695, %v1668_v9  ;;  %v2534_v9 = vld [vmem:[%s3584_s7 + $0x4] sm:$0xf] }
 0x2c1   : > { %v1661_v11 = vpop.xlane.xlu0 %1660 }
 0x2c2   : > { %2898 = vpow2.f32 %v1672_v10  ;;  %v1669_v12 = vsub.f32 %v1653_v54, %v1661_v11 }
 0x2c4   : > { %v1674_v13 = vmul.f32 1.442695, %v1669_v12 }
 0x2c5   : > { %v1664_v14 = vpop.xlane.xlu1 %1663 }
 0x2c6   : > { %2900 = vpow2.f32 %v1674_v13  ;;  %v1670_v15 = vsub.f32 %v1654_v61, %v1664_v14 }
 0x2c8   : > { %v1676_v16 = vmul.f32 1.442695, %v1670_v15 }
 0x2c9   : > { %v1667_v17 = vpop.xlane.xlu1 %1666 }
 0x2ca   : > { %2902 = vpow2.f32 %v1676_v16  ;;  %v1671_v18 = vsub.f32 %v1655_v3, %v1667_v17  ;;  %v1978_v16 = vsel %vm1707_vm4, %v2534_v9, 0 }
 0x2cc   : > { %v2899_v19 = vpop.eup %2898  ;;  %v1678_v20 = vmul.f32 1.442695, %v1671_v18 }
 0x2cd   : > { %v1680_v21 = vsel %vm614_vm2, %v2899_v19, 0.0 }
 0x2ce   : > { %2904 = vpow2.f32 %v1678_v20  ;;  %1681 = vadd.xlane.f32.xlu0 %v1680_v21 }
 0x2d0   : > { %v2901_v22 = vpop.eup %2900 }
 0x2d1   : > { %v1683_v23 = vsel %vm614_vm2, %v2901_v22, 0.0 }
 0x2d2   : > { %1684 = vadd.xlane.f32.xlu1 %v1683_v23 }
 0x2d4   : > { %v2903_v24 = vpop.eup %2902 }
 0x2d5   : > { %v1686_v25 = vsel %vm614_vm2, %v2903_v24, 0.0 }
 0x2d6   : > { %1687 = vadd.xlane.f32.xlu0 %v1686_v25 }
 0x2d8   : > { %v2905_v26 = vpop.eup %2904 }
 0x2d9   : > { %v1689_v27 = vsel %vm614_vm2, %v2905_v26, 0.0 }
 0x2da   : > { %1690 = vadd.xlane.f32.xlu1 %v1689_v27 }
 0x35b   : > { %v1682_v28 = vpop.xlane.xlu0 %1681 }
 0x35c   : > { %2906 = vrcp.f32 %v1682_v28 }
 0x35f   : > { %v1685_v29 = vpop.xlane.xlu1 %1684 }
 0x360   : > { %2908 = vrcp.f32 %v1685_v29 }
 0x363   : > { %v1688_v30 = vpop.xlane.xlu0 %1687 }
 0x364   : > { %2910 = vrcp.f32 %v1688_v30  ;;  %v2538_v30 = vld [vmem:[%s3584_s7 + $0xc] sm:$0xf] }
 0x366   : > { %v2907_v32 = vpop.eup %2906 }
 0x367   : > { %v1696_v33 = vmul.f32 %v2907_v32, %v2899_v19  ;;  %v1691_v34 = vpop.xlane.xlu1 %1690  ;;  %v2096_v32 = vsel %vm1707_vm4, %v2538_v30, 0 }
 0x368   : > { %2912 = vrcp.f32 %v1691_v34 }
 0x369   : > { %v1700_v37 = vpack.c.bf16 %v1696_v33, %v1696_v33 }
 0x36a   : > { %v2909_v38 = vpop.eup %2908 }
 0x36b   : > { %v1697_v39 = vmul.f32 %v2909_v38, %v2901_v22  ;;  %2749 = vmatmul.mubr.msk.bf16.vlgmr.msra.gmra.mrb[32].mxu0 %vm614_vm2, %v1700_v37  ;;  %v2536_v22 = vld [vmem:[%s3584_s7 + $0x8] sm:$0xf]  ;;  %v1900_v37 = vadd.f32 %v2918_v36, %v2532_v35 }
 0x36c   : > { %2759 = vmatpush3.bf16.msra.mxu0 %v1801_v40  ;;  %2760 = vmatprep.mubr.msk.bf16.mxu0 %vm2984_vm0, %v2983_v1 }
 0x36d   : > { %v1701_v42 = vpack.c.bf16 %v1697_v39, %v1697_v39  ;;  %2770 = vmatprep.subr.bf16.mxu0 %v2983_v1 }
 0x36e   : > { %v2911_v43 = vpop.eup %2910 }
 0x36f   : > { %v1698_v44 = vmul.f32 %v2911_v43, %v2903_v24  ;;  %2755 = vmatmul.mubr.msk.bf16.vlgmr.msra.gmra.mrb[32].mxu1 %vm614_vm2, %v1701_v42  ;;  %v2037_v24 = vsel %vm1707_vm4, %v2536_v22, 0 }
 0x370   : > { %2765 = vmatpush3.bf16.msra.mxu1 %v1847_v45  ;;  %2766 = vmatprep.mubr.msk.bf16.mxu1 %vm2984_vm0, %v2983_v1 }
 0x371   : > { %v1702_v46 = vpack.c.bf16 %v1698_v44, %v1698_v44  ;;  %2794 = vmatprep.subr.bf16.mxu1 %v2983_v1 }
 0x372   : > { %v2913_v47 = vpop.eup %2912 }
 0x373   : > { %v1699_v48 = vmul.f32 %v2913_v47, %v2905_v26  ;;  %2761 = vmatmul.mubr.msk.bf16.vlgmr.msra.gmra.mrb[36].mxu0 %vm614_vm2, %v1702_v46 }
 0x374   : > { %2772 = vmatprep.mubr.msk.bf16.mxu0 %vm2984_vm0, %v2983_v1  ;;  %2771 = vmatpush3.bf16.msra.mxu0 %v1919_v51 }
 0x375   : > { %v1703_v49 = vpack.c.bf16 %v1699_v48, %v1699_v48  ;;  %2776 = vmatprep.subr.bf16.mxu0 %v2983_v1 }
 0x377   : > { %2767 = vmatmul.mubr.msk.bf16.vlgmr.msra.gmra.mrb[36].mxu1 %vm614_vm2, %v1703_v49  ;;  %v2892_v49 = vld [vmem:[%s3588_s11] sm:$0xff]  }
 0x378   : > { %2798 = vmatprep.mubr.msk.bf16.mxu1 %vm2984_vm0, %v2983_v1  ;;  %2795 = vmatpush3.bf16.msra.mxu1 %v2892_v49 }
 0x379   : > { %2796 = vmatprep.subr.bf16.mxu1 %v2983_v1 }
 0x37c   : > { %2797 = vmatpush3.bf16.msra.mxu1 %v2893_v50 }
 0x37d   : > { %2802 = vmatprep.subr.bf16.mxu1 %v2983_v1 }
 0x43e   : > { %v1745_v52 = vpop.f32.mrb[32].mxu0 }
 0x43f   : > { %1889 = vst.msk [vmem:[#allocation6] sm:$0xff] %vm614_vm2, %v1745_v52  ;;  %v2750_v53 = vpop.f32.mrb[33].mxu0 }
 0x440   : > { %v1748_v54 = vpop.f32.mrb[34].mxu0 }
 0x441   : > { %v2751_v55 = vpop.f32.mrb[35].mxu0 }
 0x442   : > { %v1791_v56 = vpop.f32.mrb[32].mxu1  ;;  %v2540_v55 = vld [vmem:[%s3586_s9] ss:$0 sm:$0xff] }
 0x443   : > { %1890 = vst.msk [vmem:[#allocation6 + $0x8] sm:$0xff] %vm614_vm2, %v1791_v56  ;;  %v2756_v57 = vpop.f32.mrb[33].mxu1 }
 0x444   : > { %v1794_v58 = vpop.f32.mrb[34].mxu1  ;;  %v2541_v57 = vld [vmem:[%s3587_s10] ss:$0 sm:$0xff] }
 0x445   : > { %v2757_v59 = vpop.f32.mrb[35].mxu1 }
 0x446   : > { %v1901_v60 = vld [vmem:[#allocation6] sm:$0x3]  ;;  %v1837_v61 = vpop.f32.mrb[36].mxu0  ;;  %v1962_v10 = vld [vmem:[#allocation6 + $0x2] sm:$0x3] }
 0x447   : > { %1902 = vst.msk [vmem:[#allocation2] sm:$0x3] %vm617_vm3, %v1901_v60  ;;  %v2762_v62 = vpop.f32.mrb[37].mxu0  ;;  %v2021_v17 = vld [vmem:[#allocation6 + $0x4] sm:$0x3]  ;;  %v2894_v60 = vld [vmem:[%s3590_s13] sm:$0xff]  }
 0x448   : > { %1891 = vst.msk [vmem:[#allocation6 + $0x10] sm:$0xff] %vm614_vm2, %v1837_v61  ;;  %v1840_v63 = vpop.f32.mrb[38].mxu0  ;;  %v2080_v25 = vld [vmem:[#allocation6 + $0x6] sm:$0x3] }
 0x449   : > { %v2763_v2 = vpop.f32.mrb[39].mxu0  ;;  %v2895_v62 = vld [vmem:[%s3590_s13 + $0x8] sm:$0xff]   ;;  %v2896_v63 = vld [vmem:[%s3590_s13 + $0x10] sm:$0xff]  }
 0x44a   : > { %v1904_v0 = vld [vmem:[#allocation6 + $0x8] sm:$0x3]  ;;  %v1883_v3 = vpop.f32.mrb[36].mxu1  ;;  %v1964_v11 = vld [vmem:[#allocation6 + $0xa] sm:$0x3] }
 0x44b   : > { %1905 = vst.msk [vmem:[#allocation2 + $0x2] sm:$0x3] %vm617_vm3, %v1904_v0  ;;  %v2768_v4 = vpop.f32.mrb[37].mxu1  ;;  %v2023_v18 = vld [vmem:[#allocation6 + $0xc] sm:$0x3]  ;;  %v2897_v0 = vld [vmem:[%s3590_s13 + $0x18] sm:$0xff]  }
 0x44c   : > { %1892 = vst.msk [vmem:[#allocation6 + $0x18] sm:$0xff] %vm614_vm2, %v1883_v3  ;;  %v1886_v5 = vpop.f32.mrb[38].mxu1  ;;  %v2082_v26 = vld [vmem:[#allocation6 + $0xe] sm:$0x3]  ;;  %v2542_v2 = vld [vmem:[%s3589_s12] ss:$0 sm:$0xff] }
 0x44d   : > { %v2769_v6 = vpop.f32.mrb[39].mxu1 }
 0x44f   : > { %v1907_v7 = vld [vmem:[#allocation6 + $0x10] sm:$0x3]  ;;  %v1966_v12 = vld [vmem:[#allocation6 + $0x12] sm:$0x3]  ;;  %v2025_v19 = vld [vmem:[#allocation6 + $0x14] sm:$0x3] }
 0x450   : > { %1908 = vst.msk [vmem:[#allocation2 + $0x4] sm:$0x3] %vm617_vm3, %v1907_v7  ;;  %v2084_v27 = vld [vmem:[#allocation6 + $0x16] sm:$0x3] }
 0x453   : > { %v1910_v8 = vld [vmem:[#allocation6 + $0x18] sm:$0x3]  ;;  %v1968_v13 = vld [vmem:[#allocation6 + $0x1a] sm:$0x3]  ;;  %v2027_v20 = vld [vmem:[#allocation6 + $0x1c] sm:$0x3] }
 0x454   : > { %1911 = vst.msk [vmem:[#allocation2 + $0x6] sm:$0x3] %vm617_vm3, %v1910_v8  ;;  %v2086_v28 = vld [vmem:[#allocation6 + $0x1e] sm:$0x3] }
 0x45b   : > { %v1912_v14 = vld [vmem:[#allocation2] sm:$0xff] }
 0x45c   : > { %v1913_v15 = vpack.c.bf16 %v1912_v14, %v1912_v14  ;;  %1963 = vst.msk [vmem:[#allocation2] sm:$0x3] %vm617_vm3, %v1962_v10  ;;  %1965 = vst.msk [vmem:[#allocation2 + $0x2] sm:$0x3] %vm617_vm3, %v1964_v11 }
 0x45d   : > { %1967 = vst.msk [vmem:[#allocation2 + $0x4] sm:$0x3] %vm617_vm3, %v1966_v12  ;;  %1969 = vst.msk [vmem:[#allocation2 + $0x6] sm:$0x3] %vm617_vm3, %v1968_v13 }
 0x45e   : > { %2773 = vmatmul.mubr.msk.bf16.vlgmr.msra.gmra.mrb[40].mxu0 %vm614_vm2, %v1913_v15 }
 0x45f   : > { %2777 = vmatpush3.bf16.msra.mxu0 %v1978_v16  ;;  %2778 = vmatprep.mubr.msk.bf16.mxu0 %vm2984_vm0, %v2983_v1 }
 0x460   : > { %2782 = vmatprep.subr.bf16.mxu0 %v2983_v1 }
 0x464   : > { %v1970_v21 = vld [vmem:[#allocation2] sm:$0xff] }
 0x465   : > { %2022 = vst.msk [vmem:[#allocation2] sm:$0x3] %vm617_vm3, %v2021_v17  ;;  %2024 = vst.msk [vmem:[#allocation2 + $0x2] sm:$0x3] %vm617_vm3, %v2023_v18  ;;  %v1971_v23 = vpack.c.bf16 %v1970_v21, %v1970_v21 }
 0x466   : > { %2026 = vst.msk [vmem:[#allocation2 + $0x4] sm:$0x3] %vm617_vm3, %v2025_v19  ;;  %2028 = vst.msk [vmem:[#allocation2 + $0x6] sm:$0x3] %vm617_vm3, %v2027_v20 }
 0x46a   : > { %2779 = vmatmul.mubr.msk.bf16.vlgmr.msra.gmra.mrb[40].mxu0 %vm614_vm2, %v1971_v23 }
 0x46b   : > { %2783 = vmatpush3.bf16.msra.mxu0 %v2037_v24  ;;  %2784 = vmatprep.mubr.msk.bf16.mxu0 %vm2984_vm0, %v2983_v1 }
 0x46c   : > { %2788 = vmatprep.subr.bf16.mxu0 %v2983_v1 }
 0x46d   : > { %v2029_v29 = vld [vmem:[#allocation2] sm:$0xff] }
 0x46e   : > { %2081 = vst.msk [vmem:[#allocation2] sm:$0x3] %vm617_vm3, %v2080_v25  ;;  %2083 = vst.msk [vmem:[#allocation2 + $0x2] sm:$0x3] %vm617_vm3, %v2082_v26  ;;  %v2030_v31 = vpack.c.bf16 %v2029_v29, %v2029_v29  ;;  %v2552_v26 = vld [vmem:[%s3592_s15] ss:$0 sm:$0xff] }
 0x46f   : > { %2085 = vst.msk [vmem:[#allocation2 + $0x4] sm:$0x3] %vm617_vm3, %v2084_v27  ;;  %2087 = vst.msk [vmem:[#allocation2 + $0x6] sm:$0x3] %vm617_vm3, %v2086_v28  ;;  %v2553_v28 = vld [vmem:[%s3593_s16] ss:$0 sm:$0xff] }
 0x476   : > { %2785 = vmatmul.mubr.msk.bf16.vlgmr.msra.gmra.mrb[40].mxu0 %vm614_vm2, %v2030_v31  ;;  %v2088_v33 = vld [vmem:[#allocation2] sm:$0xff] }
 0x477   : > { %2789 = vmatpush3.bf16.msra.mxu0 %v2096_v32  ;;  %2790 = vmatprep.mubr.msk.bf16.mxu0 %vm2984_vm0, %v2983_v1  ;;  %v2089_v34 = vpack.c.bf16 %v2088_v33, %v2088_v33 }
 0x482   : > { %2791 = vmatmul.mubr.msk.bf16.vlgmr.msra.gmra.mrb[40].mxu0 %vm614_vm2, %v2089_v34 }
 0x555   : > { %v2132_v38 = vpop.f32.mrb[40].mxu0 }
 0x556   : > { %v2814_v39 = vadd.f32 %v2132_v38, %v1900_v37  ;;  %v2792_v40 = vpop.f32.mrb[41].mxu0 }
 0x557   : > { %v2135_v41 = vpop.f32.mrb[42].mxu0 }
 0x558   : > { %v2793_v42 = vpop.f32.mrb[43].mxu0  ;;  %v2139_v43 = vsel %vm570_vm1, %v2814_v39, 0.0 }
 0x559   : > { %2140 = vadd.xlane.f32.xlu0 %v2139_v43 }
 0x5e6   : > { %v2141_v44 = vpop.xlane.xlu0 %2140 }
 0x5e7   : > { %v2143_v45 = vmul.f32 0.03125, %v2141_v44 }
 0x5e9   : > { %v2144_v46 = vsub.f32 %v2814_v39, %v2143_v45 }
 0x5eb   : > { %v2145_v47 = vmul.f32 %v2144_v46, %v2144_v46 }
 0x5ed   : > { %v2146_v48 = vsel %vm570_vm1, %v2145_v47, 0.0 }
 0x5ee   : > { %2147 = vadd.xlane.f32.xlu1 %v2146_v48 }
 0x67b   : > { %v2148_v51 = vpop.xlane.xlu1 %2147 }
 0x67c   : > { %v2149_v52 = vmul.f32 0.03125, %v2148_v51 }
 0x67e   : > { %v2150_v53 = vadd.f32 1e-05, %v2149_v52 }
 0x680   : > { %2914 = vrsqrt.f32 %v2150_v53 }
 0x68a   : > { %v2915_v54 = vpop.eup %2914 }
 0x68b   : > { %v2152_v56 = vmul.f32 %v2915_v54, %v2144_v46 }
 0x68d   : > { %v2160_v58 = vmul.f32 %v2540_v55, %v2152_v56 }
 0x68f   : > { %v2168_v59 = vadd.f32 %v2541_v57, %v2160_v58 }
 0x691   : > { %v2169_v61 = vpack.c.bf16 %v2168_v59, %v2168_v59 }
 0x693   : > { %2799 = vmatmul.mubr.msk.bf16.vlgmr.msra.gmra.mrb[40].mxu1 %vm570_vm1, %v2169_v61 }
 0x694   : > { %2803 = vmatpush3.bf16.msra.mxu1 %v2894_v60  ;;  %2810 = vmatprep.mubr.msk.bf16.mxu1 %vm2984_vm0, %v2983_v1 }
 0x695   : > { %2804 = vmatprep.subr.bf16.mxu1 %v2983_v1 }
 0x698   : > { %2805 = vmatpush3.bf16.msra.mxu1 %v2895_v62 }
 0x699   : > { %2806 = vmatprep.subr.bf16.mxu1 %v2983_v1 }
 0x69c   : > { %2807 = vmatpush3.bf16.msra.mxu1 %v2896_v63 }
 0x69d   : > { %2808 = vmatprep.subr.bf16.mxu1 %v2983_v1  ;;  %v2546_v1 = vld [vmem:[%s3591_s14] ss:$0 sm:$0xff] }
 0x6a0   : > { %2809 = vmatpush3.bf16.msra.mxu1 %v2897_v0 }
 0x766   : > { %v2230_v3 = vpop.f32.mrb[40].mxu1 }
 0x767   : > { %v2231_v4 = vadd.f32 %v2542_v2, %v2230_v3  ;;  %v2800_v5 = vpop.f32.mrb[41].mxu1 }
 0x768   : > { %v2233_v6 = vpop.f32.mrb[42].mxu1 }
 0x769   : > { %v2236_v7 = vmax.f32 %v2231_v4, 0.0  ;;  %v2801_v8 = vpop.f32.mrb[43].mxu1 }
 0x76b   : > { %v2237_v9 = vpack.c.bf16 %v2236_v7, %v2236_v7 }
 0x76d   : > { %2811 = vmatmul.mubr.msk.bf16.vlgmr.msra.gmra.mrb[44].mxu1 %vm2277_vm5, %v2237_v9 }
 0x840   : > { %v2315_v10 = vpop.f32.mrb[44].mxu1 }
 0x841   : > { %v2316_v11 = vadd.f32 %v2546_v1, %v2315_v10  ;;  %v2812_v12 = vpop.f32.mrb[45].mxu1 }
 0x842   : > { %v2318_v13 = vpop.f32.mrb[46].mxu1 }
 0x843   : > { %v2813_v14 = vpop.f32.mrb[47].mxu1  ;;  %v2321_v15 = vadd.f32 %v2316_v11, %v2168_v59 }
 0x845   : > { %v2322_v16 = vsel %vm570_vm1, %v2321_v15, 0.0 }
 0x846   : > { %2323 = vadd.xlane.f32.xlu0 %v2322_v16 }
 0x8d3   : > { %v2324_v17 = vpop.xlane.xlu0 %2323 }
 0x8d4   : > { %v2325_v18 = vmul.f32 0.03125, %v2324_v17 }
 0x8d6   : > { %v2326_v19 = vsub.f32 %v2321_v15, %v2325_v18 }
 0x8d8   : > { %v2327_v20 = vmul.f32 %v2326_v19, %v2326_v19 }
 0x8da   : > { %v2328_v21 = vsel %vm570_vm1, %v2327_v20, 0.0 }
 0x8db   : > { %2329 = vadd.xlane.f32.xlu1 %v2328_v21 }
 0x968   : > { %v2330_v22 = vpop.xlane.xlu1 %2329 }
 0x969   : > { %v2331_v23 = vmul.f32 0.03125, %v2330_v22 }
 0x96b   : > { %v2332_v24 = vadd.f32 1e-05, %v2331_v23 }
 0x96d   : > { %2916 = vrsqrt.f32 %v2332_v24 }
 0x977   : > { %v2917_v25 = vpop.eup %2916 }
 0x978   : > { %v2334_v27 = vmul.f32 %v2917_v25, %v2326_v19 }
 0x97a   : > { %v2342_v29 = vmul.f32 %v2552_v26, %v2334_v27 }
 0x97c   : > { %v2350_v30 = vadd.f32 %v2553_v28, %v2342_v29 }
 0x97e   : > { %2351 = vst.msk [vmem:[%s539_s19] sm:$0xff] %vm570_vm1, %v2350_v30 }
 0x97f   : > { %2932 = shalt.err (!%p2929_p3)
}
 0x980   : > { %s2933_s2 = scalar_lea.hbm %s3534_s3, 128  ;;  %s2937_s29 = scalar_lea.hbm %s3594_s17, 256 }
 0x981   : > { %p2934_p4 = scmp.ne.s32.totalorder %s3534_s3, %s2933_s2  ;;  %p2938_p9 = scmp.lt.u32.totalorder %s3534_s3, %s3594_s17 }
 0x982   : > { %p2939_p10 = scmp.lt.u32.totalorder %s2937_s29, %s2933_s2  ;;  %p2941_p12 = scmp.lt.u32.totalorder %s2933_s2, %s3534_s3 }
 0x983   : > { %p2935_p7 = pnand %p2934_p4, %p3114_p5 }
 0x984   : > { %p2940_p11 = por %p2939_p10, %p2938_p9 }
 0x985   : > { %p2936_p8 = pneg %p2935_p7 }
 0x986   : > { %p2942_p13 = por %p2941_p12, %p2940_p11 }
 0x988   : > { %p2943_p0 = pnand %p2942_p13, %p2936_p8 }
 0x98a   : > { %2946 = shalt.err (!%p2943_p0)
}
 0x98b   : > { %2827 = dma.vmem_to_hbm [thread:$0]  (%p3114_p5), %s3536_s30, 128, %s3534_s3, %s2353_s0  }
 0x98c PF: > { %s3616_s24 = sld [smem:[#allocation10_spill]]  ;;  %p2833_p1 = scmp.ge.s32.totalorder %s2981_s27, 2 }
 0x98e   : > { %p2830_p2 = pnand %p2833_p1, %p3118_p6 }
 0x992   : > { %s2378_s22 = sand.u32 1, %s3616_s24  }
 0x993   : > { %s2379_s26 = scalar_lea.sflag [#allocation8], %s2378_s22 }
 0x994   : > { %2964 = dma.done.wait (!%p2830_p2), %s2379_s26, 128  }
 0x995   : > { %2966 = vsyncadd (!%p2830_p2), %s2379_s26, 4294967168  ;;  %s3618_s27 = sld [smem:[#allocation12_spill]]  ;;  %s3619_s2 = sld [smem:[#allocation11_spill]] }
 0x996   : > { %s3620_s26 = sld [smem:[#allocation13_spill]]  ;;  %s3621_s24 = smov %s2973_s25 }
 0x99b   : > { %p27_p3 = scmp.ge.s32.totalorder %s3618_s27, 4   ;;  %s3622_s25 = smov %s3619_s2 }
 0x99d   :  { %29 = sbr.rel (!%p27_p3) target bundleno = 8 (0x8), region = 156 }
 0x9a4   :  { %2384 = vsyncpa [#allocation8], 1 }
 0x9a5   :  { %2386 = vsyncpa [#allocation8 + $0x1], 1 }

</bundles_post_ra>
